<compile_context>
chip_gen: v7x
topology: tpu7x:2x2x1
jax: 0.10.0
libtpu: 0.0.40
codegen_flags: <defaults>
</compile_context>

<pallas_src>
import math

import jax
import jax.numpy as jnp
from jax import lax
from jax.experimental import pallas as pl
from jax.experimental.pallas import tpu as pltpu

# ----- small CLIP-text-like config ------------------------------------------
VOCAB = 1000      # vocab size
B = 2             # batch
S = 8             # sequence length
D = 32            # hidden size
H = 4             # attention heads
HD = D // H       # head dim
FF = 64           # intermediate (MLP) size
LAYERS = 2        # number of encoder layers
EPS = 1e-5        # LayerNorm eps
NEG_INF = -1e30   # additive causal-mask value (fully masked)


# ----- in-kernel helpers ------------------------------------------------------
def _layer_norm(x, g, b):
    mu = jnp.mean(x, axis=-1, keepdims=True)
    var = jnp.mean((x - mu) ** 2, axis=-1, keepdims=True)
    return (x - mu) * lax.rsqrt(var + EPS) * g + b


def _quick_gelu(x):
    # CLIP uses quick_gelu: x * sigmoid(1.702 * x)
    return x * jax.nn.sigmoid(1.702 * x)


# ----- Pallas kernel: one (batch element, layer) grid step --------------------
def clip_layer_kernel(x_ref, lnfg_ref, lnfb_ref,
                      ln1g_ref, ln1b_ref,
                      wq_ref, bq_ref, wk_ref, bk_ref, wv_ref, bv_ref,
                      wo_ref, bo_ref,
                      ln2g_ref, ln2b_ref,
                      w1_ref, b1_ref, w2_ref, b2_ref,
                      y_ref,
                      x_sc):
    """One encoder layer for one batch element.

    x_ref:  (1, S, D) f32   token+position embeddings (block per example).
    weights: per-layer blocks streamed along the 'arbitrary' layer grid axis
             (attention projections are head-major: (1, H, D, HD) / (1, H, HD, D)).
    y_ref:  (1, S, D) f32   written only on the last layer (final LayerNorm).
    x_sc:   (S, D) f32      VMEM-resident residual stream across the layer axis.
    """
    l = pl.program_id(1)
    n_layers = pl.num_programs(1)

    # Load residual stream into VMEM scratch on the first layer step of this
    # batch element; it stays resident across the whole layer loop.
    @pl.when(l == 0)
    def _():
        x_sc[...] = x_ref[0]

    x = x_sc[...]                                     # (S, D) f32
    scale = 1.0 / math.sqrt(HD)
    qk_dims = (((1,), (1,)), ((), ()))                # contract last dims (q·k^T)

    # Causal additive mask, generated in-kernel (no (B·S)^2 bias array).
    row = lax.broadcasted_iota(jnp.int32, (S, S), 0)
    col = lax.broadcasted_iota(jnp.int32, (S, S), 1)
    causal_bias = jnp.where(col <= row, 0.0, NEG_INF).astype(jnp.float32)

    # --- causal self-attention block (pre-LN) ---
    h = _layer_norm(x, ln1g_ref[0], ln1b_ref[0])      # f32
    hb = h.astype(jnp.bfloat16)                       # bf16 MXU inputs, f32 acc

    attn = jnp.zeros((S, D), jnp.float32)
    for hh in range(H):                               # static unroll; head-major
        # Per-head weight access is a free leading-axis index (no lane slices).
        q_h = jnp.dot(hb, wq_ref[0, hh],
                      preferred_element_type=jnp.float32) + bq_ref[0, hh]
        k_h = jnp.dot(hb, wk_ref[0, hh],
                      preferred_element_type=jnp.float32) + bk_ref[0, hh]
        v_h = jnp.dot(hb, wv_ref[0, hh],
                      preferred_element_type=jnp.float32) + bv_ref[0, hh]
        s = lax.dot_general((q_h * scale).astype(jnp.bfloat16),
                            k_h.astype(jnp.bfloat16), qk_dims,
                            preferred_element_type=jnp.float32)      # (S, S)
        s = s + causal_bias
        # exact softmax in f32 (parity with PyTorch; mask math stays f32)
        s = s - jnp.max(s, axis=-1, keepdims=True)
        p = jnp.exp(s)
        p = p / jnp.sum(p, axis=-1, keepdims=True)
        o_h = jnp.dot(p.astype(jnp.bfloat16), v_h.astype(jnp.bfloat16),
                      preferred_element_type=jnp.float32)            # (S, HD)
        # Accumulate this head directly into the output projection (no concat).
        attn = attn + jnp.dot(o_h.astype(jnp.bfloat16), wo_ref[0, hh],
                              preferred_element_type=jnp.float32)
    x = x + attn + bo_ref[0]

    # --- MLP block (pre-LN, quick-GELU) ---
    h2 = _layer_norm(x, ln2g_ref[0], ln2b_ref[0])
    g = jnp.dot(h2.astype(jnp.bfloat16), w1_ref[0],
                preferred_element_type=jnp.float32) + b1_ref[0]
    g = _quick_gelu(g)                                # f32 VPU/EUP math
    g = jnp.dot(g.astype(jnp.bfloat16), w2_ref[0],
                preferred_element_type=jnp.float32) + b2_ref[0]
    x = x + g

    x_sc[...] = x

    # --- final LayerNorm, only after the last layer ---
    @pl.when(l == n_layers - 1)
    def _():
        y_ref[0] = _layer_norm(x, lnfg_ref[...], lnfb_ref[...])


# ----- pallas_call wrapper ----------------------------------------------------
WEIGHT_ORDER = ("ln1_g", "ln1_b", "wq", "bq", "wk", "bk", "wv", "bv",
                "wo", "bo", "ln2_g", "ln2_b", "w1", "b1", "w2", "b2")


def run_clip_text_encoder(x, stacked, final_g, final_b):
    """x: (B, S, D) f32 → (B, S, D) f32.  grid = (batch, layer)."""
    assert x.shape == (B, S, D)
    assert stacked["wq"].shape == (LAYERS, H, D, HD)
    assert stacked["wo"].shape == (LAYERS, H, HD, D)
    assert stacked["w1"].shape == (LAYERS, D, FF)

    def per_batch(shape):
        # activation / output blocks: one example, resident across layer axis
        return pl.BlockSpec(shape, lambda b, l: (b,) + (0,) * (len(shape) - 1))

    def per_layer(shape):
        # weight blocks: streamed (double-buffered) along the layer axis
        return pl.BlockSpec(shape, lambda b, l: (l,) + (0,) * (len(shape) - 1))

    def broadcast(shape):
        return pl.BlockSpec(shape, lambda b, l: (0,) * len(shape))

    weight_specs = [per_layer((1,) + tuple(stacked[n].shape[1:]))
                    for n in WEIGHT_ORDER]

    in_specs = ([per_batch((1, S, D)),          # x
                 broadcast((1, D)),             # final LN gamma
                 broadcast((1, D))]             # final LN beta
                + weight_specs)
    out_specs = per_batch((1, S, D))

    # Advisory cost estimate so XLA schedules glue ops around the call.
    flops_per_row = 8 * D * D + 4 * S * D + 4 * D * FF
    flops = B * LAYERS * S * flops_per_row
    transcendentals = B * LAYERS * (H * S * S + S * FF)
    weight_bytes = sum(int(stacked[n].size) * stacked[n].dtype.itemsize
                       for n in WEIGHT_ORDER)
    bytes_accessed = B * weight_bytes + 2 * B * S * D * 4

    return pl.pallas_call(
        clip_layer_kernel,
        out_shape=jax.ShapeDtypeStruct((B, S, D), jnp.float32),
        grid_spec=pltpu.PrefetchScalarGridSpec(
            num_scalar_prefetch=0,
            grid=(B, LAYERS),
            in_specs=in_specs,
            out_specs=out_specs,
            scratch_shapes=[pltpu.VMEM((S, D), jnp.float32)],   # residual stream
        ),
        compiler_params=pltpu.CompilerParams(
            # batch across TensorCores (v7x); layer axis carries the residual.
            dimension_semantics=("parallel", "arbitrary"),
            # TODO(synk): re-derive per generation at real dims (64 MiB v7x).
            vmem_limit_bytes=32 * 1024 * 1024,
        ),
        cost_estimate=pl.CostEstimate(
            flops=flops, transcendentals=transcendentals,
            bytes_accessed=bytes_accessed),
    )(x, final_g, final_b, *[stacked[n] for n in WEIGHT_ORDER])


# ----- parameter init (deterministic, synthetic) ------------------------------
def init_params(key):
    def dense(k, fan_in, fan_out):
        return 0.02 * jax.random.normal(k, (fan_in, fan_out), jnp.float32)

    keys = jax.random.split(key, 2 + LAYERS)
    params = {
        "token_embedding": 0.02 * jax.random.normal(
            keys[0], (VOCAB, D), jnp.float32),
        "position_embedding": 0.01 * jax.random.normal(
            keys[1], (S, D), jnp.float32),
        "final_ln_g": jnp.ones((1, D), jnp.float32),
        "final_ln_b": jnp.zeros((1, D), jnp.float32),
        "layers": [],
    }
    for li in range(LAYERS):
        lk = jax.random.split(keys[2 + li], 6)
        params["layers"].append({
            "ln1_g": jnp.ones((1, D), jnp.float32),
            "ln1_b": jnp.zeros((1, D), jnp.float32),
            "wq": dense(lk[0], D, D), "bq": jnp.zeros((1, D), jnp.float32),
            "wk": dense(lk[1], D, D), "bk": jnp.zeros((1, D), jnp.float32),
            "wv": dense(lk[2], D, D), "bv": jnp.zeros((1, D), jnp.float32),
            "wo": dense(lk[3], D, D), "bo": jnp.zeros((1, D), jnp.float32),
            "ln2_g": jnp.ones((1, D), jnp.float32),
            "ln2_b": jnp.zeros((1, D), jnp.float32),
            "w1": dense(lk[4], D, FF), "b1": jnp.zeros((1, FF), jnp.float32),
            "w2": dense(lk[5], FF, D), "b2": jnp.zeros((1, D), jnp.float32),
        })
    return params


def prepare_weights(params):
    """Stack per-layer params (leading layer axis), re-layout attention
    projections head-major, and cast matmul weights to bf16 (wrapper-side
    layout plumbing, done once)."""
    layers = params["layers"]

    def head_major_in(w):    # (D, D) -> (H, D, HD): out-features grouped per head
        return w.reshape(D, H, HD).transpose(1, 0, 2)

    def head_major_bias(b):  # (1, D) -> (H, 1, HD)
        return b.reshape(1, H, HD).transpose(1, 0, 2)

    def head_major_out(w):   # (D, D) -> (H, HD, D): in-rows grouped per head
        return w.reshape(H, HD, D)

    stacked = {}

    def stack(name, fn=lambda a: a, dtype=jnp.float32):
        stacked[name] = jnp.stack([fn(lp[name]) for lp in layers]).astype(dtype)

    stack("ln1_g"); stack("ln1_b")
    stack("wq", head_major_in, jnp.bfloat16); stack("bq", head_major_bias)
    stack("wk", head_major_in, jnp.bfloat16); stack("bk", head_major_bias)
    stack("wv", head_major_in, jnp.bfloat16); stack("bv", head_major_bias)
    stack("wo", head_major_out, jnp.bfloat16); stack("bo")
    stack("ln2_g"); stack("ln2_b")
    stack("w1", dtype=jnp.bfloat16); stack("b1")
    stack("w2", dtype=jnp.bfloat16); stack("b2")
    return stacked


# ----- full forward (glue in plain JAX, transformer in one gridded Pallas call)
def clip_text_forward(input_ids, params):
    # TODO(synk): fold the token-embedding gather into the kernel via
    # PrefetchScalarGridSpec scalar prefetch + pl.Element row-gather at real
    # dims; kept as plain-JAX glue here.
    tok = jnp.take(params["token_embedding"], input_ids, axis=0)      # (B,S,D)
    pos = params["position_embedding"][None, :, :]                    # (1,S,D)
    x = (tok + pos).astype(jnp.float32)                               # (B,S,D)

    stacked = prepare_weights(params)
    y = run_clip_text_encoder(x, stacked,
                              params["final_ln_g"], params["final_ln_b"])
    # TODO(synk): HF CLIPTextModel also computes pooler_output; the wrapper
    # only returns last_hidden_state, so it is omitted here.
    return {"last_hidden_state": y}


# ----- pure-JAX reference (f32) for correctness check --------------------------
def clip_text_reference(input_ids, params):
    tok = jnp.take(params["token_embedding"], input_ids, axis=0)
    x = tok + params["position_embedding"][None, :, :]
    mask = jnp.where(jnp.arange(S)[None, :] <= jnp.arange(S)[:, None],
                     0.0, NEG_INF).astype(jnp.float32)
    scale = 1.0 / math.sqrt(HD)

    def ln(v, g, b):
        mu = v.mean(-1, keepdims=True)
        var = ((v - mu) ** 2).mean(-1, keepdims=True)
        return (v - mu) / jnp.sqrt(var + EPS) * g + b

    for lp in params["layers"]:
        h = ln(x, lp["ln1_g"], lp["ln1_b"])
        q = (h @ lp["wq"] + lp["bq"]).reshape(B, S, H, HD).transpose(0, 2, 1, 3)
        k = (h @ lp["wk"] + lp["bk"]).reshape(B, S, H, HD).transpose(0, 2, 1, 3)
        v = (h @ lp["wv"] + lp["bv"]).reshape(B, S, H, HD).transpose(0, 2, 1, 3)
        s = jnp.einsum("bhqd,bhkd->bhqk", q * scale, k) + mask
        p = jax.nn.softmax(s, axis=-1)
        o = jnp.einsum("bhqk,bhkd->bhqd", p, v).transpose(0, 2, 1, 3).reshape(B, S, D)
        x = x + o @ lp["wo"] + lp["bo"]
        h2 = ln(x, lp["ln2_g"], lp["ln2_b"])
        g = h2 @ lp["w1"] + lp["b1"]
        g = g * jax.nn.sigmoid(1.702 * g)
        x = x + g @ lp["w2"] + lp["b2"]
    return ln(x, params["final_ln_g"], params["final_ln_b"])


if __name__ == "__main__":
    key = jax.random.PRNGKey(0)
    pkey, dkey = jax.random.split(key)
    params = init_params(pkey)
    input_ids = jax.random.randint(dkey, (B, S), 0, VOCAB, dtype=jnp.int32)

    out = jax.jit(clip_text_forward)(input_ids, params)
    last_hidden_state = jax.block_until_ready(out["last_hidden_state"])

    assert last_hidden_state.shape == (B, S, D)
    assert last_hidden_state.dtype == jnp.float32
    assert bool(jnp.all(jnp.isfinite(last_hidden_state)))

    ref = jax.block_until_ready(clip_text_reference(input_ids, params))
    max_err = float(jnp.max(jnp.abs(last_hidden_state - ref)))
    # Loose tolerance: kernel uses bf16 weights / matmul inputs with f32 acc.
    assert max_err < 2e-2, f"max abs error vs reference: {max_err}"

    print("KERNEL_OK")
</pallas_src>

<mosaic_0001>
module attributes {stable_mosaic.version = 11 : i64} {
  func.func @clip_layer_kernel(%arg0: i32, %arg1: i32, %arg2: memref<1x8x32xf32, #tpu.memory_space<vmem>>, %arg3: memref<1x32xf32, #tpu.memory_space<vmem>>, %arg4: memref<1x32xf32, #tpu.memory_space<vmem>>, %arg5: memref<1x1x32xf32, #tpu.memory_space<vmem>>, %arg6: memref<1x1x32xf32, #tpu.memory_space<vmem>>, %arg7: memref<1x4x32x8xbf16, #tpu.memory_space<vmem>>, %arg8: memref<1x4x1x8xf32, #tpu.memory_space<vmem>>, %arg9: memref<1x4x32x8xbf16, #tpu.memory_space<vmem>>, %arg10: memref<1x4x1x8xf32, #tpu.memory_space<vmem>>, %arg11: memref<1x4x32x8xbf16, #tpu.memory_space<vmem>>, %arg12: memref<1x4x1x8xf32, #tpu.memory_space<vmem>>, %arg13: memref<1x4x8x32xbf16, #tpu.memory_space<vmem>>, %arg14: memref<1x1x32xf32, #tpu.memory_space<vmem>>, %arg15: memref<1x1x32xf32, #tpu.memory_space<vmem>>, %arg16: memref<1x1x32xf32, #tpu.memory_space<vmem>>, %arg17: memref<1x32x64xbf16, #tpu.memory_space<vmem>>, %arg18: memref<1x1x64xf32, #tpu.memory_space<vmem>>, %arg19: memref<1x64x32xbf16, #tpu.memory_space<vmem>>, %arg20: memref<1x1x32xf32, #tpu.memory_space<vmem>>, %arg21: memref<1x8x32xf32, #tpu.memory_space<vmem>>, %arg22: memref<8x32xf32, #tpu.memory_space<vmem>>) attributes {dimension_semantics = [#tpu.dimension_semantics<parallel>, #tpu.dimension_semantics<arbitrary>], iteration_bounds = array<i64: 2, 2>, scalar_prefetch = 0 : i64, scratch_operands = 1 : i64, tpu.core_type = #tpu.core_type<tc>, window_params = [{transform_indices = @transform_0, window_bounds = array<i64: 1, 8, 32>}, {pipeline_mode = #tpu.pipeline_mode<synchronous>, transform_indices = @transform_1, window_bounds = array<i64: 1, 32>}, {pipeline_mode = #tpu.pipeline_mode<synchronous>, transform_indices = @transform_2, window_bounds = array<i64: 1, 32>}, {transform_indices = @transform_3, window_bounds = array<i64: 1, 1, 32>}, {transform_indices = @transform_4, window_bounds = array<i64: 1, 1, 32>}, {transform_indices = @transform_5, window_bounds = array<i64: 1, 4, 32, 8>}, {transform_indices = @transform_6, window_bounds = array<i64: 1, 4, 1, 8>}, {transform_indices = @transform_7, window_bounds = array<i64: 1, 4, 32, 8>}, {transform_indices = @transform_8, window_bounds = array<i64: 1, 4, 1, 8>}, {transform_indices = @transform_9, window_bounds = array<i64: 1, 4, 32, 8>}, {transform_indices = @transform_10, window_bounds = array<i64: 1, 4, 1, 8>}, {transform_indices = @transform_11, window_bounds = array<i64: 1, 4, 8, 32>}, {transform_indices = @transform_12, window_bounds = array<i64: 1, 1, 32>}, {transform_indices = @transform_13, window_bounds = array<i64: 1, 1, 32>}, {transform_indices = @transform_14, window_bounds = array<i64: 1, 1, 32>}, {transform_indices = @transform_15, window_bounds = array<i64: 1, 32, 64>}, {transform_indices = @transform_16, window_bounds = array<i64: 1, 1, 64>}, {transform_indices = @transform_17, window_bounds = array<i64: 1, 64, 32>}, {transform_indices = @transform_18, window_bounds = array<i64: 1, 1, 32>}, {transform_indices = @transform_19, window_bounds = array<i64: 1, 8, 32>}]} {
    %c0_i32 = arith.constant 0 : i32
    %0 = arith.cmpi eq, %arg1, %c0_i32 : i32
    %1 = arith.extui %0 : i1 to i32
    %c0_i32_0 = arith.constant 0 : i32
    %2 = arith.cmpi ne, %1, %c0_i32_0 : i32
    scf.if %2 {
      %c0_193 = arith.constant 0 : index
      %c0_194 = arith.constant 0 : index
      %c0_195 = arith.constant 0 : index
      %274 = vector.load %arg2[%c0_193, %c0_194, %c0_195] : memref<1x8x32xf32, #tpu.memory_space<vmem>>, vector<1x8x32xf32>
      %275 = vector.shape_cast %274 : vector<1x8x32xf32> to vector<8x32xf32>
      %c0_196 = arith.constant 0 : index
      %c0_197 = arith.constant 0 : index
      %276 = vector.load %arg22[%c0_196, %c0_197] : memref<8x32xf32, #tpu.memory_space<vmem>>, vector<8x32xf32>
      tpu.vector_store %arg22[%c0_196, %c0_197], %275 {strides = array<i32>} : memref<8x32xf32, #tpu.memory_space<vmem>>, vector<8x32xf32>,
    } else {
    }
    %c0 = arith.constant 0 : index
    %c0_1 = arith.constant 0 : index
    %3 = vector.load %arg22[%c0, %c0_1] : memref<8x32xf32, #tpu.memory_space<vmem>>, vector<8x32xf32>
    %4 = tpu.iota {dimensions = array<i32: 0>} : vector<8x8xi32>
    %5 = tpu.iota {dimensions = array<i32: 1>} : vector<8x8xi32>
    %6 = arith.cmpi sle, %5, %4 : vector<8x8xi32>
    %cst = arith.constant 0.000000e+00 : f32
    %cst_2 = arith.constant -1.000000e+30 : f32
    %7 = vector.broadcast %cst : f32 to vector<8x8xf32>
    %8 = vector.broadcast %cst_2 : f32 to vector<8x8xf32>
    %9 = arith.select %6, %7, %8 : vector<8x8xi1>, vector<8x8xf32>
    %c0_3 = arith.constant 0 : index
    %c0_4 = arith.constant 0 : index
    %c0_5 = arith.constant 0 : index
    %10 = vector.load %arg5[%c0_3, %c0_4, %c0_5] : memref<1x1x32xf32, #tpu.memory_space<vmem>>, vector<1x1x32xf32>
    %11 = vector.shape_cast %10 : vector<1x1x32xf32> to vector<1x32xf32>
    %c0_6 = arith.constant 0 : index
    %c0_7 = arith.constant 0 : index
    %c0_8 = arith.constant 0 : index
    %12 = vector.load %arg6[%c0_6, %c0_7, %c0_8] : memref<1x1x32xf32, #tpu.memory_space<vmem>>, vector<1x1x32xf32>
    %13 = vector.shape_cast %12 : vector<1x1x32xf32> to vector<1x32xf32>
    %cst_9 = arith.constant dense<0.000000e+00> : vector<8xf32>
    %14 = vector.multi_reduction <add>, %3, %cst_9 [1] : vector<8x32xf32> to vector<8xf32>
    %15 = vector.shape_cast %14 : vector<8xf32> to vector<8x1xf32>
    %cst_10 = arith.constant 3.200000e+01 : f32
    %16 = vector.broadcast %cst_10 : f32 to vector<8x1xf32>
    %17 = arith.divf %15, %16 : vector<8x1xf32>
    %18 = vector.broadcast %17 : vector<8x1xf32> to vector<8x32xf32>
    %19 = arith.subf %3, %18 : vector<8x32xf32>
    %20 = arith.mulf %19, %19 : vector<8x32xf32>
    %cst_11 = arith.constant dense<0.000000e+00> : vector<8xf32>
    %21 = vector.multi_reduction <add>, %20, %cst_11 [1] : vector<8x32xf32> to vector<8xf32>
    %22 = vector.shape_cast %21 : vector<8xf32> to vector<8x1xf32>
    %cst_12 = arith.constant 3.200000e+01 : f32
    %23 = vector.broadcast %cst_12 : f32 to vector<8x1xf32>
    %24 = arith.divf %22, %23 : vector<8x1xf32>
    %25 = vector.broadcast %17 : vector<8x1xf32> to vector<8x32xf32>
    %26 = arith.subf %3, %25 : vector<8x32xf32>
    %cst_13 = arith.constant 9.99999974E-6 : f32
    %27 = vector.broadcast %cst_13 : f32 to vector<8x1xf32>
    %28 = arith.addf %24, %27 : vector<8x1xf32>
    %29 = math.rsqrt %28 : vector<8x1xf32>
    %30 = vector.broadcast %29 : vector<8x1xf32> to vector<8x32xf32>
    %31 = arith.mulf %26, %30 : vector<8x32xf32>
    %32 = vector.broadcast %11 : vector<1x32xf32> to vector<8x32xf32>
    %33 = arith.mulf %31, %32 : vector<8x32xf32>
    %34 = vector.broadcast %13 : vector<1x32xf32> to vector<8x32xf32>
    %35 = arith.addf %33, %34 : vector<8x32xf32>
    %36 = arith.truncf %35 : vector<8x32xf32> to vector<8x32xbf16>
    %cst_14 = arith.constant 0.000000e+00 : f32
    %37 = vector.broadcast %cst_14 : f32 to vector<8x32xf32>
    %c0_15 = arith.constant 0 : index
    %c0_16 = arith.constant 0 : index
    %c0_17 = arith.constant 0 : index
    %c0_18 = arith.constant 0 : index
    %38 = vector.load %arg7[%c0_15, %c0_16, %c0_17, %c0_18] : memref<1x4x32x8xbf16, #tpu.memory_space<vmem>>, vector<1x1x32x8xbf16>
    %39 = vector.shape_cast %38 : vector<1x1x32x8xbf16> to vector<32x8xbf16>
    %cst_19 = arith.constant dense<0.000000e+00> : vector<8x8xf32>
    %40 = tpu.matmul %36, %39, %cst_19 {dimension_numbers = #tpu.dot_dimension_numbers<[1], [0], [0], [1], [0, 0, 1, 1], [], []>} : vector<8x32xbf16>, vector<32x8xbf16>, vector<8x8xf32> -> vector<8x8xf32>
    %c0_20 = arith.constant 0 : index
    %c0_21 = arith.constant 0 : index
    %c0_22 = arith.constant 0 : index
    %c0_23 = arith.constant 0 : index
    %41 = vector.load %arg8[%c0_20, %c0_21, %c0_22, %c0_23] : memref<1x4x1x8xf32, #tpu.memory_space<vmem>>, vector<1x1x1x8xf32>
    %42 = vector.shape_cast %41 : vector<1x1x1x8xf32> to vector<1x8xf32>
    %43 = vector.broadcast %42 : vector<1x8xf32> to vector<8x8xf32>
    %44 = arith.addf %40, %43 : vector<8x8xf32>
    %c0_24 = arith.constant 0 : index
    %c0_25 = arith.constant 0 : index
    %c0_26 = arith.constant 0 : index
    %c0_27 = arith.constant 0 : index
    %45 = vector.load %arg9[%c0_24, %c0_25, %c0_26, %c0_27] : memref<1x4x32x8xbf16, #tpu.memory_space<vmem>>, vector<1x1x32x8xbf16>
    %46 = vector.shape_cast %45 : vector<1x1x32x8xbf16> to vector<32x8xbf16>
    %cst_28 = arith.constant dense<0.000000e+00> : vector<8x8xf32>
    %47 = tpu.matmul %36, %46, %cst_28 {dimension_numbers = #tpu.dot_dimension_numbers<[1], [0], [0], [1], [0, 0, 1, 1], [], []>} : vector<8x32xbf16>, vector<32x8xbf16>, vector<8x8xf32> -> vector<8x8xf32>
    %c0_29 = arith.constant 0 : index
    %c0_30 = arith.constant 0 : index
    %c0_31 = arith.constant 0 : index
    %c0_32 = arith.constant 0 : index
    %48 = vector.load %arg10[%c0_29, %c0_30, %c0_31, %c0_32] : memref<1x4x1x8xf32, #tpu.memory_space<vmem>>, vector<1x1x1x8xf32>
    %49 = vector.shape_cast %48 : vector<1x1x1x8xf32> to vector<1x8xf32>
    %50 = vector.broadcast %49 : vector<1x8xf32> to vector<8x8xf32>
    %51 = arith.addf %47, %50 : vector<8x8xf32>
    %c0_33 = arith.constant 0 : index
    %c0_34 = arith.constant 0 : index
    %c0_35 = arith.constant 0 : index
    %c0_36 = arith.constant 0 : index
    %52 = vector.load %arg11[%c0_33, %c0_34, %c0_35, %c0_36] : memref<1x4x32x8xbf16, #tpu.memory_space<vmem>>, vector<1x1x32x8xbf16>
    %53 = vector.shape_cast %52 : vector<1x1x32x8xbf16> to vector<32x8xbf16>
    %cst_37 = arith.constant dense<0.000000e+00> : vector<8x8xf32>
    %54 = tpu.matmul %36, %53, %cst_37 {dimension_numbers = #tpu.dot_dimension_numbers<[1], [0], [0], [1], [0, 0, 1, 1], [], []>} : vector<8x32xbf16>, vector<32x8xbf16>, vector<8x8xf32> -> vector<8x8xf32>
    %c0_38 = arith.constant 0 : index
    %c0_39 = arith.constant 0 : index
    %c0_40 = arith.constant 0 : index
    %c0_41 = arith.constant 0 : index
    %55 = vector.load %arg12[%c0_38, %c0_39, %c0_40, %c0_41] : memref<1x4x1x8xf32, #tpu.memory_space<vmem>>, vector<1x1x1x8xf32>
    %56 = vector.shape_cast %55 : vector<1x1x1x8xf32> to vector<1x8xf32>
    %57 = vector.broadcast %56 : vector<1x8xf32> to vector<8x8xf32>
    %58 = arith.addf %54, %57 : vector<8x8xf32>
    %cst_42 = arith.constant 0.353553385 : f32
    %59 = vector.broadcast %cst_42 : f32 to vector<8x8xf32>
    %60 = arith.mulf %44, %59 : vector<8x8xf32>
    %61 = arith.truncf %60 : vector<8x8xf32> to vector<8x8xbf16>
    %62 = arith.truncf %51 : vector<8x8xf32> to vector<8x8xbf16>
    %cst_43 = arith.constant dense<0.000000e+00> : vector<8x8xf32>
    %63 = tpu.matmul %61, %62, %cst_43 {dimension_numbers = #tpu.dot_dimension_numbers<[1], [1], [0], [0], [0, 0, 1, 0], [], []>} : vector<8x8xbf16>, vector<8x8xbf16>, vector<8x8xf32> -> vector<8x8xf32>
    %64 = arith.addf %63, %9 : vector<8x8xf32>
    %cst_44 = arith.constant dense<0xFF800000> : vector<8xf32>
    %65 = vector.multi_reduction <maximumf>, %64, %cst_44 [1] : vector<8x8xf32> to vector<8xf32>
    %66 = vector.shape_cast %65 : vector<8xf32> to vector<8x1xf32>
    %67 = vector.broadcast %66 : vector<8x1xf32> to vector<8x8xf32>
    %68 = arith.subf %64, %67 : vector<8x8xf32>
    %69 = math.exp %68 : vector<8x8xf32>
    %cst_45 = arith.constant dense<0.000000e+00> : vector<8xf32>
    %70 = vector.multi_reduction <add>, %69, %cst_45 [1] : vector<8x8xf32> to vector<8xf32>
    %71 = vector.shape_cast %70 : vector<8xf32> to vector<8x1xf32>
    %72 = vector.broadcast %71 : vector<8x1xf32> to vector<8x8xf32>
    %73 = arith.divf %69, %72 : vector<8x8xf32>
    %74 = arith.truncf %73 : vector<8x8xf32> to vector<8x8xbf16>
    %75 = arith.truncf %58 : vector<8x8xf32> to vector<8x8xbf16>
    %cst_46 = arith.constant dense<0.000000e+00> : vector<8x8xf32>
    %76 = tpu.matmul %74, %75, %cst_46 {dimension_numbers = #tpu.dot_dimension_numbers<[1], [0], [0], [1], [0, 0, 1, 1], [], []>} : vector<8x8xbf16>, vector<8x8xbf16>, vector<8x8xf32> -> vector<8x8xf32>
    %77 = arith.truncf %76 : vector<8x8xf32> to vector<8x8xbf16>
    %c0_47 = arith.constant 0 : index
    %c0_48 = arith.constant 0 : index
    %c0_49 = arith.constant 0 : index
    %c0_50 = arith.constant 0 : index
    %78 = vector.load %arg13[%c0_47, %c0_48, %c0_49, %c0_50] : memref<1x4x8x32xbf16, #tpu.memory_space<vmem>>, vector<1x1x8x32xbf16>
    %79 = vector.shape_cast %78 : vector<1x1x8x32xbf16> to vector<8x32xbf16>
    %cst_51 = arith.constant dense<0.000000e+00> : vector<8x32xf32>
    %80 = tpu.matmul %77, %79, %cst_51 {dimension_numbers = #tpu.dot_dimension_numbers<[1], [0], [0], [1], [0, 0, 1, 1], [], []>} : vector<8x8xbf16>, vector<8x32xbf16>, vector<8x32xf32> -> vector<8x32xf32>
    %81 = arith.addf %37, %80 : vector<8x32xf32>
    %c0_52 = arith.constant 0 : index
    %c1 = arith.constant 1 : index
    %c0_53 = arith.constant 0 : index
    %c0_54 = arith.constant 0 : index
    %82 = vector.load %arg7[%c0_52, %c1, %c0_53, %c0_54] : memref<1x4x32x8xbf16, #tpu.memory_space<vmem>>, vector<1x1x32x8xbf16>
    %83 = vector.shape_cast %82 : vector<1x1x32x8xbf16> to vector<32x8xbf16>
    %cst_55 = arith.constant dense<0.000000e+00> : vector<8x8xf32>
    %84 = tpu.matmul %36, %83, %cst_55 {dimension_numbers = #tpu.dot_dimension_numbers<[1], [0], [0], [1], [0, 0, 1, 1], [], []>} : vector<8x32xbf16>, vector<32x8xbf16>, vector<8x8xf32> -> vector<8x8xf32>
    %c0_56 = arith.constant 0 : index
    %c1_57 = arith.constant 1 : index
    %c0_58 = arith.constant 0 : index
    %c0_59 = arith.constant 0 : index
    %85 = vector.load %arg8[%c0_56, %c1_57, %c0_58, %c0_59] : memref<1x4x1x8xf32, #tpu.memory_space<vmem>>, vector<1x1x1x8xf32>
    %86 = vector.shape_cast %85 : vector<1x1x1x8xf32> to vector<1x8xf32>
    %87 = vector.broadcast %86 : vector<1x8xf32> to vector<8x8xf32>
    %88 = arith.addf %84, %87 : vector<8x8xf32>
    %c0_60 = arith.constant 0 : index
    %c1_61 = arith.constant 1 : index
    %c0_62 = arith.constant 0 : index
    %c0_63 = arith.constant 0 : index
    %89 = vector.load %arg9[%c0_60, %c1_61, %c0_62, %c0_63] : memref<1x4x32x8xbf16, #tpu.memory_space<vmem>>, vector<1x1x32x8xbf16>
    %90 = vector.shape_cast %89 : vector<1x1x32x8xbf16> to vector<32x8xbf16>
    %cst_64 = arith.constant dense<0.000000e+00> : vector<8x8xf32>
    %91 = tpu.matmul %36, %90, %cst_64 {dimension_numbers = #tpu.dot_dimension_numbers<[1], [0], [0], [1], [0, 0, 1, 1], [], []>} : vector<8x32xbf16>, vector<32x8xbf16>, vector<8x8xf32> -> vector<8x8xf32>
    %c0_65 = arith.constant 0 : index
    %c1_66 = arith.constant 1 : index
    %c0_67 = arith.constant 0 : index
    %c0_68 = arith.constant 0 : index
    %92 = vector.load %arg10[%c0_65, %c1_66, %c0_67, %c0_68] : memref<1x4x1x8xf32, #tpu.memory_space<vmem>>, vector<1x1x1x8xf32>
    %93 = vector.shape_cast %92 : vector<1x1x1x8xf32> to vector<1x8xf32>
    %94 = vector.broadcast %93 : vector<1x8xf32> to vector<8x8xf32>
    %95 = arith.addf %91, %94 : vector<8x8xf32>
    %c0_69 = arith.constant 0 : index
    %c1_70 = arith.constant 1 : index
    %c0_71 = arith.constant 0 : index
    %c0_72 = arith.constant 0 : index
    %96 = vector.load %arg11[%c0_69, %c1_70, %c0_71, %c0_72] : memref<1x4x32x8xbf16, #tpu.memory_space<vmem>>, vector<1x1x32x8xbf16>
    %97 = vector.shape_cast %96 : vector<1x1x32x8xbf16> to vector<32x8xbf16>
    %cst_73 = arith.constant dense<0.000000e+00> : vector<8x8xf32>
    %98 = tpu.matmul %36, %97, %cst_73 {dimension_numbers = #tpu.dot_dimension_numbers<[1], [0], [0], [1], [0, 0, 1, 1], [], []>} : vector<8x32xbf16>, vector<32x8xbf16>, vector<8x8xf32> -> vector<8x8xf32>
    %c0_74 = arith.constant 0 : index
    %c1_75 = arith.constant 1 : index
    %c0_76 = arith.constant 0 : index
    %c0_77 = arith.constant 0 : index
    %99 = vector.load %arg12[%c0_74, %c1_75, %c0_76, %c0_77] : memref<1x4x1x8xf32, #tpu.memory_space<vmem>>, vector<1x1x1x8xf32>
    %100 = vector.shape_cast %99 : vector<1x1x1x8xf32> to vector<1x8xf32>
    %101 = vector.broadcast %100 : vector<1x8xf32> to vector<8x8xf32>
    %102 = arith.addf %98, %101 : vector<8x8xf32>
    %cst_78 = arith.constant 0.353553385 : f32
    %103 = vector.broadcast %cst_78 : f32 to vector<8x8xf32>
    %104 = arith.mulf %88, %103 : vector<8x8xf32>
    %105 = arith.truncf %104 : vector<8x8xf32> to vector<8x8xbf16>
    %106 = arith.truncf %95 : vector<8x8xf32> to vector<8x8xbf16>
    %cst_79 = arith.constant dense<0.000000e+00> : vector<8x8xf32>
    %107 = tpu.matmul %105, %106, %cst_79 {dimension_numbers = #tpu.dot_dimension_numbers<[1], [1], [0], [0], [0, 0, 1, 0], [], []>} : vector<8x8xbf16>, vector<8x8xbf16>, vector<8x8xf32> -> vector<8x8xf32>
    %108 = arith.addf %107, %9 : vector<8x8xf32>
    %cst_80 = arith.constant dense<0xFF800000> : vector<8xf32>
    %109 = vector.multi_reduction <maximumf>, %108, %cst_80 [1] : vector<8x8xf32> to vector<8xf32>
    %110 = vector.shape_cast %109 : vector<8xf32> to vector<8x1xf32>
    %111 = vector.broadcast %110 : vector<8x1xf32> to vector<8x8xf32>
    %112 = arith.subf %108, %111 : vector<8x8xf32>
    %113 = math.exp %112 : vector<8x8xf32>
    %cst_81 = arith.constant dense<0.000000e+00> : vector<8xf32>
    %114 = vector.multi_reduction <add>, %113, %cst_81 [1] : vector<8x8xf32> to vector<8xf32>
    %115 = vector.shape_cast %114 : vector<8xf32> to vector<8x1xf32>
    %116 = vector.broadcast %115 : vector<8x1xf32> to vector<8x8xf32>
    %117 = arith.divf %113, %116 : vector<8x8xf32>
    %118 = arith.truncf %117 : vector<8x8xf32> to vector<8x8xbf16>
    %119 = arith.truncf %102 : vector<8x8xf32> to vector<8x8xbf16>
    %cst_82 = arith.constant dense<0.000000e+00> : vector<8x8xf32>
    %120 = tpu.matmul %118, %119, %cst_82 {dimension_numbers = #tpu.dot_dimension_numbers<[1], [0], [0], [1], [0, 0, 1, 1], [], []>} : vector<8x8xbf16>, vector<8x8xbf16>, vector<8x8xf32> -> vector<8x8xf32>
    %121 = arith.truncf %120 : vector<8x8xf32> to vector<8x8xbf16>
    %c0_83 = arith.constant 0 : index
    %c1_84 = arith.constant 1 : index
    %c0_85 = arith.constant 0 : index
    %c0_86 = arith.constant 0 : index
    %122 = vector.load %arg13[%c0_83, %c1_84, %c0_85, %c0_86] : memref<1x4x8x32xbf16, #tpu.memory_space<vmem>>, vector<1x1x8x32xbf16>
    %123 = vector.shape_cast %122 : vector<1x1x8x32xbf16> to vector<8x32xbf16>
    %cst_87 = arith.constant dense<0.000000e+00> : vector<8x32xf32>
    %124 = tpu.matmul %121, %123, %cst_87 {dimension_numbers = #tpu.dot_dimension_numbers<[1], [0], [0], [1], [0, 0, 1, 1], [], []>} : vector<8x8xbf16>, vector<8x32xbf16>, vector<8x32xf32> -> vector<8x32xf32>
    %125 = arith.addf %81, %124 : vector<8x32xf32>
    %c0_88 = arith.constant 0 : index
    %c2 = arith.constant 2 : index
    %c0_89 = arith.constant 0 : index
    %c0_90 = arith.constant 0 : index
    %126 = vector.load %arg7[%c0_88, %c2, %c0_89, %c0_90] : memref<1x4x32x8xbf16, #tpu.memory_space<vmem>>, vector<1x1x32x8xbf16>
    %127 = vector.shape_cast %126 : vector<1x1x32x8xbf16> to vector<32x8xbf16>
    %cst_91 = arith.constant dense<0.000000e+00> : vector<8x8xf32>
    %128 = tpu.matmul %36, %127, %cst_91 {dimension_numbers = #tpu.dot_dimension_numbers<[1], [0], [0], [1], [0, 0, 1, 1], [], []>} : vector<8x32xbf16>, vector<32x8xbf16>, vector<8x8xf32> -> vector<8x8xf32>
    %c0_92 = arith.constant 0 : index
    %c2_93 = arith.constant 2 : index
    %c0_94 = arith.constant 0 : index
    %c0_95 = arith.constant 0 : index
    %129 = vector.load %arg8[%c0_92, %c2_93, %c0_94, %c0_95] : memref<1x4x1x8xf32, #tpu.memory_space<vmem>>, vector<1x1x1x8xf32>
    %130 = vector.shape_cast %129 : vector<1x1x1x8xf32> to vector<1x8xf32>
    %131 = vector.broadcast %130 : vector<1x8xf32> to vector<8x8xf32>
    %132 = arith.addf %128, %131 : vector<8x8xf32>
    %c0_96 = arith.constant 0 : index
    %c2_97 = arith.constant 2 : index
    %c0_98 = arith.constant 0 : index
    %c0_99 = arith.constant 0 : index
    %133 = vector.load %arg9[%c0_96, %c2_97, %c0_98, %c0_99] : memref<1x4x32x8xbf16, #tpu.memory_space<vmem>>, vector<1x1x32x8xbf16>
    %134 = vector.shape_cast %133 : vector<1x1x32x8xbf16> to vector<32x8xbf16>
    %cst_100 = arith.constant dense<0.000000e+00> : vector<8x8xf32>
    %135 = tpu.matmul %36, %134, %cst_100 {dimension_numbers = #tpu.dot_dimension_numbers<[1], [0], [0], [1], [0, 0, 1, 1], [], []>} : vector<8x32xbf16>, vector<32x8xbf16>, vector<8x8xf32> -> vector<8x8xf32>
    %c0_101 = arith.constant 0 : index
    %c2_102 = arith.constant 2 : index
    %c0_103 = arith.constant 0 : index
    %c0_104 = arith.constant 0 : index
    %136 = vector.load %arg10[%c0_101, %c2_102, %c0_103, %c0_104] : memref<1x4x1x8xf32, #tpu.memory_space<vmem>>, vector<1x1x1x8xf32>
    %137 = vector.shape_cast %136 : vector<1x1x1x8xf32> to vector<1x8xf32>
    %138 = vector.broadcast %137 : vector<1x8xf32> to vector<8x8xf32>
    %139 = arith.addf %135, %138 : vector<8x8xf32>
    %c0_105 = arith.constant 0 : index
    %c2_106 = arith.constant 2 : index
    %c0_107 = arith.constant 0 : index
    %c0_108 = arith.constant 0 : index
    %140 = vector.load %arg11[%c0_105, %c2_106, %c0_107, %c0_108] : memref<1x4x32x8xbf16, #tpu.memory_space<vmem>>, vector<1x1x32x8xbf16>
    %141 = vector.shape_cast %140 : vector<1x1x32x8xbf16> to vector<32x8xbf16>
    %cst_109 = arith.constant dense<0.000000e+00> : vector<8x8xf32>
    %142 = tpu.matmul %36, %141, %cst_109 {dimension_numbers = #tpu.dot_dimension_numbers<[1], [0], [0], [1], [0, 0, 1, 1], [], []>} : vector<8x32xbf16>, vector<32x8xbf16>, vector<8x8xf32> -> vector<8x8xf32>
    %c0_110 = arith.constant 0 : index
    %c2_111 = arith.constant 2 : index
    %c0_112 = arith.constant 0 : index
    %c0_113 = arith.constant 0 : index
    %143 = vector.load %arg12[%c0_110, %c2_111, %c0_112, %c0_113] : memref<1x4x1x8xf32, #tpu.memory_space<vmem>>, vector<1x1x1x8xf32>
    %144 = vector.shape_cast %143 : vector<1x1x1x8xf32> to vector<1x8xf32>
    %145 = vector.broadcast %144 : vector<1x8xf32> to vector<8x8xf32>
    %146 = arith.addf %142, %145 : vector<8x8xf32>
    %cst_114 = arith.constant 0.353553385 : f32
    %147 = vector.broadcast %cst_114 : f32 to vector<8x8xf32>
    %148 = arith.mulf %132, %147 : vector<8x8xf32>
    %149 = arith.truncf %148 : vector<8x8xf32> to vector<8x8xbf16>
    %150 = arith.truncf %139 : vector<8x8xf32> to vector<8x8xbf16>
    %cst_115 = arith.constant dense<0.000000e+00> : vector<8x8xf32>
    %151 = tpu.matmul %149, %150, %cst_115 {dimension_numbers = #tpu.dot_dimension_numbers<[1], [1], [0], [0], [0, 0, 1, 0], [], []>} : vector<8x8xbf16>, vector<8x8xbf16>, vector<8x8xf32> -> vector<8x8xf32>
    %152 = arith.addf %151, %9 : vector<8x8xf32>
    %cst_116 = arith.constant dense<0xFF800000> : vector<8xf32>
    %153 = vector.multi_reduction <maximumf>, %152, %cst_116 [1] : vector<8x8xf32> to vector<8xf32>
    %154 = vector.shape_cast %153 : vector<8xf32> to vector<8x1xf32>
    %155 = vector.broadcast %154 : vector<8x1xf32> to vector<8x8xf32>
    %156 = arith.subf %152, %155 : vector<8x8xf32>
    %157 = math.exp %156 : vector<8x8xf32>
    %cst_117 = arith.constant dense<0.000000e+00> : vector<8xf32>
    %158 = vector.multi_reduction <add>, %157, %cst_117 [1] : vector<8x8xf32> to vector<8xf32>
    %159 = vector.shape_cast %158 : vector<8xf32> to vector<8x1xf32>
    %160 = vector.broadcast %159 : vector<8x1xf32> to vector<8x8xf32>
    %161 = arith.divf %157, %160 : vector<8x8xf32>
    %162 = arith.truncf %161 : vector<8x8xf32> to vector<8x8xbf16>
    %163 = arith.truncf %146 : vector<8x8xf32> to vector<8x8xbf16>
    %cst_118 = arith.constant dense<0.000000e+00> : vector<8x8xf32>
    %164 = tpu.matmul %162, %163, %cst_118 {dimension_numbers = #tpu.dot_dimension_numbers<[1], [0], [0], [1], [0, 0, 1, 1], [], []>} : vector<8x8xbf16>, vector<8x8xbf16>, vector<8x8xf32> -> vector<8x8xf32>
    %165 = arith.truncf %164 : vector<8x8xf32> to vector<8x8xbf16>
    %c0_119 = arith.constant 0 : index
    %c2_120 = arith.constant 2 : index
    %c0_121 = arith.constant 0 : index
    %c0_122 = arith.constant 0 : index
    %166 = vector.load %arg13[%c0_119, %c2_120, %c0_121, %c0_122] : memref<1x4x8x32xbf16, #tpu.memory_space<vmem>>, vector<1x1x8x32xbf16>
    %167 = vector.shape_cast %166 : vector<1x1x8x32xbf16> to vector<8x32xbf16>
    %cst_123 = arith.constant dense<0.000000e+00> : vector<8x32xf32>
    %168 = tpu.matmul %165, %167, %cst_123 {dimension_numbers = #tpu.dot_dimension_numbers<[1], [0], [0], [1], [0, 0, 1, 1], [], []>} : vector<8x8xbf16>, vector<8x32xbf16>, vector<8x32xf32> -> vector<8x32xf32>
    %169 = arith.addf %125, %168 : vector<8x32xf32>
    %c0_124 = arith.constant 0 : index
    %c3 = arith.constant 3 : index
    %c0_125 = arith.constant 0 : index
    %c0_126 = arith.constant 0 : index
    %170 = vector.load %arg7[%c0_124, %c3, %c0_125, %c0_126] : memref<1x4x32x8xbf16, #tpu.memory_space<vmem>>, vector<1x1x32x8xbf16>
    %171 = vector.shape_cast %170 : vector<1x1x32x8xbf16> to vector<32x8xbf16>
    %cst_127 = arith.constant dense<0.000000e+00> : vector<8x8xf32>
    %172 = tpu.matmul %36, %171, %cst_127 {dimension_numbers = #tpu.dot_dimension_numbers<[1], [0], [0], [1], [0, 0, 1, 1], [], []>} : vector<8x32xbf16>, vector<32x8xbf16>, vector<8x8xf32> -> vector<8x8xf32>
    %c0_128 = arith.constant 0 : index
    %c3_129 = arith.constant 3 : index
    %c0_130 = arith.constant 0 : index
    %c0_131 = arith.constant 0 : index
    %173 = vector.load %arg8[%c0_128, %c3_129, %c0_130, %c0_131] : memref<1x4x1x8xf32, #tpu.memory_space<vmem>>, vector<1x1x1x8xf32>
    %174 = vector.shape_cast %173 : vector<1x1x1x8xf32> to vector<1x8xf32>
    %175 = vector.broadcast %174 : vector<1x8xf32> to vector<8x8xf32>
    %176 = arith.addf %172, %175 : vector<8x8xf32>
    %c0_132 = arith.constant 0 : index
    %c3_133 = arith.constant 3 : index
    %c0_134 = arith.constant 0 : index
    %c0_135 = arith.constant 0 : index
    %177 = vector.load %arg9[%c0_132, %c3_133, %c0_134, %c0_135] : memref<1x4x32x8xbf16, #tpu.memory_space<vmem>>, vector<1x1x32x8xbf16>
    %178 = vector.shape_cast %177 : vector<1x1x32x8xbf16> to vector<32x8xbf16>
    %cst_136 = arith.constant dense<0.000000e+00> : vector<8x8xf32>
    %179 = tpu.matmul %36, %178, %cst_136 {dimension_numbers = #tpu.dot_dimension_numbers<[1], [0], [0], [1], [0, 0, 1, 1], [], []>} : vector<8x32xbf16>, vector<32x8xbf16>, vector<8x8xf32> -> vector<8x8xf32>
    %c0_137 = arith.constant 0 : index
    %c3_138 = arith.constant 3 : index
    %c0_139 = arith.constant 0 : index
    %c0_140 = arith.constant 0 : index
    %180 = vector.load %arg10[%c0_137, %c3_138, %c0_139, %c0_140] : memref<1x4x1x8xf32, #tpu.memory_space<vmem>>, vector<1x1x1x8xf32>
    %181 = vector.shape_cast %180 : vector<1x1x1x8xf32> to vector<1x8xf32>
    %182 = vector.broadcast %181 : vector<1x8xf32> to vector<8x8xf32>
    %183 = arith.addf %179, %182 : vector<8x8xf32>
    %c0_141 = arith.constant 0 : index
    %c3_142 = arith.constant 3 : index
    %c0_143 = arith.constant 0 : index
    %c0_144 = arith.constant 0 : index
    %184 = vector.load %arg11[%c0_141, %c3_142, %c0_143, %c0_144] : memref<1x4x32x8xbf16, #tpu.memory_space<vmem>>, vector<1x1x32x8xbf16>
    %185 = vector.shape_cast %184 : vector<1x1x32x8xbf16> to vector<32x8xbf16>
    %cst_145 = arith.constant dense<0.000000e+00> : vector<8x8xf32>
    %186 = tpu.matmul %36, %185, %cst_145 {dimension_numbers = #tpu.dot_dimension_numbers<[1], [0], [0], [1], [0, 0, 1, 1], [], []>} : vector<8x32xbf16>, vector<32x8xbf16>, vector<8x8xf32> -> vector<8x8xf32>
    %c0_146 = arith.constant 0 : index
    %c3_147 = arith.constant 3 : index
    %c0_148 = arith.constant 0 : index
    %c0_149 = arith.constant 0 : index
    %187 = vector.load %arg12[%c0_146, %c3_147, %c0_148, %c0_149] : memref<1x4x1x8xf32, #tpu.memory_space<vmem>>, vector<1x1x1x8xf32>
    %188 = vector.shape_cast %187 : vector<1x1x1x8xf32> to vector<1x8xf32>
    %189 = vector.broadcast %188 : vector<1x8xf32> to vector<8x8xf32>
    %190 = arith.addf %186, %189 : vector<8x8xf32>
    %cst_150 = arith.constant 0.353553385 : f32
    %191 = vector.broadcast %cst_150 : f32 to vector<8x8xf32>
    %192 = arith.mulf %176, %191 : vector<8x8xf32>
    %193 = arith.truncf %192 : vector<8x8xf32> to vector<8x8xbf16>
    %194 = arith.truncf %183 : vector<8x8xf32> to vector<8x8xbf16>
    %cst_151 = arith.constant dense<0.000000e+00> : vector<8x8xf32>
    %195 = tpu.matmul %193, %194, %cst_151 {dimension_numbers = #tpu.dot_dimension_numbers<[1], [1], [0], [0], [0, 0, 1, 0], [], []>} : vector<8x8xbf16>, vector<8x8xbf16>, vector<8x8xf32> -> vector<8x8xf32>
    %196 = arith.addf %195, %9 : vector<8x8xf32>
    %cst_152 = arith.constant dense<0xFF800000> : vector<8xf32>
    %197 = vector.multi_reduction <maximumf>, %196, %cst_152 [1] : vector<8x8xf32> to vector<8xf32>
    %198 = vector.shape_cast %197 : vector<8xf32> to vector<8x1xf32>
    %199 = vector.broadcast %198 : vector<8x1xf32> to vector<8x8xf32>
    %200 = arith.subf %196, %199 : vector<8x8xf32>
    %201 = math.exp %200 : vector<8x8xf32>
    %cst_153 = arith.constant dense<0.000000e+00> : vector<8xf32>
    %202 = vector.multi_reduction <add>, %201, %cst_153 [1] : vector<8x8xf32> to vector<8xf32>
    %203 = vector.shape_cast %202 : vector<8xf32> to vector<8x1xf32>
    %204 = vector.broadcast %203 : vector<8x1xf32> to vector<8x8xf32>
    %205 = arith.divf %201, %204 : vector<8x8xf32>
    %206 = arith.truncf %205 : vector<8x8xf32> to vector<8x8xbf16>
    %207 = arith.truncf %190 : vector<8x8xf32> to vector<8x8xbf16>
    %cst_154 = arith.constant dense<0.000000e+00> : vector<8x8xf32>
    %208 = tpu.matmul %206, %207, %cst_154 {dimension_numbers = #tpu.dot_dimension_numbers<[1], [0], [0], [1], [0, 0, 1, 1], [], []>} : vector<8x8xbf16>, vector<8x8xbf16>, vector<8x8xf32> -> vector<8x8xf32>
    %209 = arith.truncf %208 : vector<8x8xf32> to vector<8x8xbf16>
    %c0_155 = arith.constant 0 : index
    %c3_156 = arith.constant 3 : index
    %c0_157 = arith.constant 0 : index
    %c0_158 = arith.constant 0 : index
    %210 = vector.load %arg13[%c0_155, %c3_156, %c0_157, %c0_158] : memref<1x4x8x32xbf16, #tpu.memory_space<vmem>>, vector<1x1x8x32xbf16>
    %211 = vector.shape_cast %210 : vector<1x1x8x32xbf16> to vector<8x32xbf16>
    %cst_159 = arith.constant dense<0.000000e+00> : vector<8x32xf32>
    %212 = tpu.matmul %209, %211, %cst_159 {dimension_numbers = #tpu.dot_dimension_numbers<[1], [0], [0], [1], [0, 0, 1, 1], [], []>} : vector<8x8xbf16>, vector<8x32xbf16>, vector<8x32xf32> -> vector<8x32xf32>
    %213 = arith.addf %169, %212 : vector<8x32xf32>
    %214 = arith.addf %3, %213 : vector<8x32xf32>
    %c0_160 = arith.constant 0 : index
    %c0_161 = arith.constant 0 : index
    %c0_162 = arith.constant 0 : index
    %215 = vector.load %arg14[%c0_160, %c0_161, %c0_162] : memref<1x1x32xf32, #tpu.memory_space<vmem>>, vector<1x1x32xf32>
    %216 = vector.shape_cast %215 : vector<1x1x32xf32> to vector<1x32xf32>
    %217 = vector.broadcast %216 : vector<1x32xf32> to vector<8x32xf32>
    %218 = arith.addf %214, %217 : vector<8x32xf32>
    %c0_163 = arith.constant 0 : index
    %c0_164 = arith.constant 0 : index
    %c0_165 = arith.constant 0 : index
    %219 = vector.load %arg15[%c0_163, %c0_164, %c0_165] : memref<1x1x32xf32, #tpu.memory_space<vmem>>, vector<1x1x32xf32>
    %220 = vector.shape_cast %219 : vector<1x1x32xf32> to vector<1x32xf32>
    %c0_166 = arith.constant 0 : index
    %c0_167 = arith.constant 0 : index
    %c0_168 = arith.constant 0 : index
    %221 = vector.load %arg16[%c0_166, %c0_167, %c0_168] : memref<1x1x32xf32, #tpu.memory_space<vmem>>, vector<1x1x32xf32>
    %222 = vector.shape_cast %221 : vector<1x1x32xf32> to vector<1x32xf32>
    %cst_169 = arith.constant dense<0.000000e+00> : vector<8xf32>
    %223 = vector.multi_reduction <add>, %218, %cst_169 [1] : vector<8x32xf32> to vector<8xf32>
    %224 = vector.shape_cast %223 : vector<8xf32> to vector<8x1xf32>
    %cst_170 = arith.constant 3.200000e+01 : f32
    %225 = vector.broadcast %cst_170 : f32 to vector<8x1xf32>
    %226 = arith.divf %224, %225 : vector<8x1xf32>
    %227 = vector.broadcast %226 : vector<8x1xf32> to vector<8x32xf32>
    %228 = arith.subf %218, %227 : vector<8x32xf32>
    %229 = arith.mulf %228, %228 : vector<8x32xf32>
    %cst_171 = arith.constant dense<0.000000e+00> : vector<8xf32>
    %230 = vector.multi_reduction <add>, %229, %cst_171 [1] : vector<8x32xf32> to vector<8xf32>
    %231 = vector.shape_cast %230 : vector<8xf32> to vector<8x1xf32>
    %cst_172 = arith.constant 3.200000e+01 : f32
    %232 = vector.broadcast %cst_172 : f32 to vector<8x1xf32>
    %233 = arith.divf %231, %232 : vector<8x1xf32>
    %234 = vector.broadcast %226 : vector<8x1xf32> to vector<8x32xf32>
    %235 = arith.subf %218, %234 : vector<8x32xf32>
    %cst_173 = arith.constant 9.99999974E-6 : f32
    %236 = vector.broadcast %cst_173 : f32 to vector<8x1xf32>
    %237 = arith.addf %233, %236 : vector<8x1xf32>
    %238 = math.rsqrt %237 : vector<8x1xf32>
    %239 = vector.broadcast %238 : vector<8x1xf32> to vector<8x32xf32>
    %240 = arith.mulf %235, %239 : vector<8x32xf32>
    %241 = vector.broadcast %220 : vector<1x32xf32> to vector<8x32xf32>
    %242 = arith.mulf %240, %241 : vector<8x32xf32>
    %243 = vector.broadcast %222 : vector<1x32xf32> to vector<8x32xf32>
    %244 = arith.addf %242, %243 : vector<8x32xf32>
    %245 = arith.truncf %244 : vector<8x32xf32> to vector<8x32xbf16>
    %c0_174 = arith.constant 0 : index
    %c0_175 = arith.constant 0 : index
    %c0_176 = arith.constant 0 : index
    %246 = vector.load %arg17[%c0_174, %c0_175, %c0_176] : memref<1x32x64xbf16, #tpu.memory_space<vmem>>, vector<1x32x64xbf16>
    %247 = vector.shape_cast %246 : vector<1x32x64xbf16> to vector<32x64xbf16>
    %cst_177 = arith.constant dense<0.000000e+00> : vector<8x64xf32>
    %248 = tpu.matmul %245, %247, %cst_177 {dimension_numbers = #tpu.dot_dimension_numbers<[1], [0], [0], [1], [0, 0, 1, 1], [], []>} : vector<8x32xbf16>, vector<32x64xbf16>, vector<8x64xf32> -> vector<8x64xf32>
    %c0_178 = arith.constant 0 : index
    %c0_179 = arith.constant 0 : index
    %c0_180 = arith.constant 0 : index
    %249 = vector.load %arg18[%c0_178, %c0_179, %c0_180] : memref<1x1x64xf32, #tpu.memory_space<vmem>>, vector<1x1x64xf32>
    %250 = vector.shape_cast %249 : vector<1x1x64xf32> to vector<1x64xf32>
    %251 = vector.broadcast %250 : vector<1x64xf32> to vector<8x64xf32>
    %252 = arith.addf %248, %251 : vector<8x64xf32>
    %cst_181 = arith.constant 1.702000e+00 : f32
    %253 = vector.broadcast %cst_181 : f32 to vector<8x64xf32>
    %254 = arith.mulf %253, %252 : vector<8x64xf32>
    %255 = arith.negf %254 : vector<8x64xf32>
    %256 = math.exp %255 : vector<8x64xf32>
    %cst_182 = arith.constant 1.000000e+00 : f32
    %257 = vector.broadcast %cst_182 : f32 to vector<8x64xf32>
    %258 = arith.addf %257, %256 : vector<8x64xf32>
    %259 = arith.divf %257, %258 : vector<8x64xf32>
    %260 = arith.mulf %252, %259 : vector<8x64xf32>
    %261 = arith.truncf %260 : vector<8x64xf32> to vector<8x64xbf16>
    %c0_183 = arith.constant 0 : index
    %c0_184 = arith.constant 0 : index
    %c0_185 = arith.constant 0 : index
    %262 = vector.load %arg19[%c0_183, %c0_184, %c0_185] : memref<1x64x32xbf16, #tpu.memory_space<vmem>>, vector<1x64x32xbf16>
    %263 = vector.shape_cast %262 : vector<1x64x32xbf16> to vector<64x32xbf16>
    %cst_186 = arith.constant dense<0.000000e+00> : vector<8x32xf32>
    %264 = tpu.matmul %261, %263, %cst_186 {dimension_numbers = #tpu.dot_dimension_numbers<[1], [0], [0], [1], [0, 0, 1, 1], [], []>} : vector<8x64xbf16>, vector<64x32xbf16>, vector<8x32xf32> -> vector<8x32xf32>
    %c0_187 = arith.constant 0 : index
    %c0_188 = arith.constant 0 : index
    %c0_189 = arith.constant 0 : index
    %265 = vector.load %arg20[%c0_187, %c0_188, %c0_189] : memref<1x1x32xf32, #tpu.memory_space<vmem>>, vector<1x1x32xf32>
    %266 = vector.shape_cast %265 : vector<1x1x32xf32> to vector<1x32xf32>
    %267 = vector.broadcast %266 : vector<1x32xf32> to vector<8x32xf32>
    %268 = arith.addf %264, %267 : vector<8x32xf32>
    %269 = arith.addf %218, %268 : vector<8x32xf32>
    %c0_190 = arith.constant 0 : index
    %c0_191 = arith.constant 0 : index
    %270 = vector.load %arg22[%c0_190, %c0_191] : memref<8x32xf32, #tpu.memory_space<vmem>>, vector<8x32xf32>
    tpu.vector_store %arg22[%c0_190, %c0_191], %269 {strides = array<i32>} : memref<8x32xf32, #tpu.memory_space<vmem>>, vector<8x32xf32>,
    %c1_i32 = arith.constant 1 : i32
    %271 = arith.cmpi eq, %arg1, %c1_i32 : i32
    %272 = arith.extui %271 : i1 to i32
    %c0_i32_192 = arith.constant 0 : i32
    %273 = arith.cmpi ne, %272, %c0_i32_192 : i32
    scf.if %273 {
      %c0_193 = arith.constant 0 : index
      %c0_194 = arith.constant 0 : index
      %274 = vector.load %arg3[%c0_193, %c0_194] : memref<1x32xf32, #tpu.memory_space<vmem>>, vector<1x32xf32>
      %c0_195 = arith.constant 0 : index
      %c0_196 = arith.constant 0 : index
      %275 = vector.load %arg4[%c0_195, %c0_196] : memref<1x32xf32, #tpu.memory_space<vmem>>, vector<1x32xf32>
      %cst_197 = arith.constant dense<0.000000e+00> : vector<8xf32>
      %276 = vector.multi_reduction <add>, %269, %cst_197 [1] : vector<8x32xf32> to vector<8xf32>
      %277 = vector.shape_cast %276 : vector<8xf32> to vector<8x1xf32>
      %cst_198 = arith.constant 3.200000e+01 : f32
      %278 = vector.broadcast %cst_198 : f32 to vector<8x1xf32>
      %279 = arith.divf %277, %278 : vector<8x1xf32>
      %280 = vector.broadcast %279 : vector<8x1xf32> to vector<8x32xf32>
      %281 = arith.subf %269, %280 : vector<8x32xf32>
      %282 = arith.mulf %281, %281 : vector<8x32xf32>
      %cst_199 = arith.constant dense<0.000000e+00> : vector<8xf32>
      %283 = vector.multi_reduction <add>, %282, %cst_199 [1] : vector<8x32xf32> to vector<8xf32>
      %284 = vector.shape_cast %283 : vector<8xf32> to vector<8x1xf32>
      %cst_200 = arith.constant 3.200000e+01 : f32
      %285 = vector.broadcast %cst_200 : f32 to vector<8x1xf32>
      %286 = arith.divf %284, %285 : vector<8x1xf32>
      %287 = vector.broadcast %279 : vector<8x1xf32> to vector<8x32xf32>
      %288 = arith.subf %269, %287 : vector<8x32xf32>
      %cst_201 = arith.constant 9.99999974E-6 : f32
      %289 = vector.broadcast %cst_201 : f32 to vector<8x1xf32>
      %290 = arith.addf %286, %289 : vector<8x1xf32>
      %291 = math.rsqrt %290 : vector<8x1xf32>
      %292 = vector.broadcast %291 : vector<8x1xf32> to vector<8x32xf32>
      %293 = arith.mulf %288, %292 : vector<8x32xf32>
      %294 = vector.broadcast %274 : vector<1x32xf32> to vector<8x32xf32>
      %295 = arith.mulf %293, %294 : vector<8x32xf32>
      %296 = vector.broadcast %275 : vector<1x32xf32> to vector<8x32xf32>
      %297 = arith.addf %295, %296 : vector<8x32xf32>
      %c0_202 = arith.constant 0 : index
      %c0_203 = arith.constant 0 : index
      %c0_204 = arith.constant 0 : index
      %298 = vector.load %arg21[%c0_202, %c0_203, %c0_204] : memref<1x8x32xf32, #tpu.memory_space<vmem>>, vector<1x8x32xf32>
      %299 = vector.shape_cast %298 : vector<1x8x32xf32> to vector<8x32xf32>
      %300 = vector.shape_cast %297 : vector<8x32xf32> to vector<1x8x32xf32>
      tpu.vector_store %arg21[%c0_202, %c0_203, %c0_204], %300 {strides = array<i32>} : memref<1x8x32xf32, #tpu.memory_space<vmem>>, vector<1x8x32xf32>,
    } else {
    }
    return
  }
  func.func @transform_0(%arg0: i32, %arg1: i32) -> (i32, i32, i32) {
    %c0_i32 = arith.constant 0 : i32
    %c0_i32_0 = arith.constant 0 : i32
    %c0_i32_1 = arith.constant 0 : i32
    return %arg0, %c0_i32, %c0_i32_0 : i32, i32, i32
  }
  func.func @transform_1(%arg0: i32, %arg1: i32) -> (i32, i32) {
    %c0_i32 = arith.constant 0 : i32
    %c0_i32_0 = arith.constant 0 : i32
    %c0_i32_1 = arith.constant 0 : i32
    return %c0_i32, %c0_i32_0 : i32, i32
  }
  func.func @transform_2(%arg0: i32, %arg1: i32) -> (i32, i32) {
    %c0_i32 = arith.constant 0 : i32
    %c0_i32_0 = arith.constant 0 : i32
    %c0_i32_1 = arith.constant 0 : i32
    return %c0_i32, %c0_i32_0 : i32, i32
  }
  func.func @transform_3(%arg0: i32, %arg1: i32) -> (i32, i32, i32) {
    %c0_i32 = arith.constant 0 : i32
    %c0_i32_0 = arith.constant 0 : i32
    %c0_i32_1 = arith.constant 0 : i32
    return %arg1, %c0_i32, %c0_i32_0 : i32, i32, i32
  }
  func.func @transform_4(%arg0: i32, %arg1: i32) -> (i32, i32, i32) {
    %c0_i32 = arith.constant 0 : i32
    %c0_i32_0 = arith.constant 0 : i32
    %c0_i32_1 = arith.constant 0 : i32
    return %arg1, %c0_i32, %c0_i32_0 : i32, i32, i32
  }
  func.func @transform_5(%arg0: i32, %arg1: i32) -> (i32, i32, i32, i32) {
    %c0_i32 = arith.constant 0 : i32
    %c0_i32_0 = arith.constant 0 : i32
    %c0_i32_1 = arith.constant 0 : i32
    %c0_i32_2 = arith.constant 0 : i32
    return %arg1, %c0_i32, %c0_i32_0, %c0_i32_1 : i32, i32, i32, i32
  }
  func.func @transform_6(%arg0: i32, %arg1: i32) -> (i32, i32, i32, i32) {
    %c0_i32 = arith.constant 0 : i32
    %c0_i32_0 = arith.constant 0 : i32
    %c0_i32_1 = arith.constant 0 : i32
    %c0_i32_2 = arith.constant 0 : i32
    return %arg1, %c0_i32, %c0_i32_0, %c0_i32_1 : i32, i32, i32, i32
  }
  func.func @transform_7(%arg0: i32, %arg1: i32) -> (i32, i32, i32, i32) {
    %c0_i32 = arith.constant 0 : i32
    %c0_i32_0 = arith.constant 0 : i32
    %c0_i32_1 = arith.constant 0 : i32
    %c0_i32_2 = arith.constant 0 : i32
    return %arg1, %c0_i32, %c0_i32_0, %c0_i32_1 : i32, i32, i32, i32
  }
  func.func @transform_8(%arg0: i32, %arg1: i32) -> (i32, i32, i32, i32) {
    %c0_i32 = arith.constant 0 : i32
    %c0_i32_0 = arith.constant 0 : i32
    %c0_i32_1 = arith.constant 0 : i32
    %c0_i32_2 = arith.constant 0 : i32
    return %arg1, %c0_i32, %c0_i32_0, %c0_i32_1 : i32, i32, i32, i32
  }
  func.func @transform_9(%arg0: i32, %arg1: i32) -> (i32, i32, i32, i32) {
    %c0_i32 = arith.constant 0 : i32
    %c0_i32_0 = arith.constant 0 : i32
    %c0_i32_1 = arith.constant 0 : i32
    %c0_i32_2 = arith.constant 0 : i32
    return %arg1, %c0_i32, %c0_i32_0, %c0_i32_1 : i32, i32, i32, i32
  }
  func.func @transform_10(%arg0: i32, %arg1: i32) -> (i32, i32, i32, i32) {
    %c0_i32 = arith.constant 0 : i32
    %c0_i32_0 = arith.constant 0 : i32
    %c0_i32_1 = arith.constant 0 : i32
    %c0_i32_2 = arith.constant 0 : i32
    return %arg1, %c0_i32, %c0_i32_0, %c0_i32_1 : i32, i32, i32, i32
  }
  func.func @transform_11(%arg0: i32, %arg1: i32) -> (i32, i32, i32, i32) {
    %c0_i32 = arith.constant 0 : i32
    %c0_i32_0 = arith.constant 0 : i32
    %c0_i32_1 = arith.constant 0 : i32
    %c0_i32_2 = arith.constant 0 : i32
    return %arg1, %c0_i32, %c0_i32_0, %c0_i32_1 : i32, i32, i32, i32
  }
  func.func @transform_12(%arg0: i32, %arg1: i32) -> (i32, i32, i32) {
    %c0_i32 = arith.constant 0 : i32
    %c0_i32_0 = arith.constant 0 : i32
    %c0_i32_1 = arith.constant 0 : i32
    return %arg1, %c0_i32, %c0_i32_0 : i32, i32, i32
  }
  func.func @transform_13(%arg0: i32, %arg1: i32) -> (i32, i32, i32) {
    %c0_i32 = arith.constant 0 : i32
    %c0_i32_0 = arith.constant 0 : i32
    %c0_i32_1 = arith.constant 0 : i32
    return %arg1, %c0_i32, %c0_i32_0 : i32, i32, i32
  }
  func.func @transform_14(%arg0: i32, %arg1: i32) -> (i32, i32, i32) {
    %c0_i32 = arith.constant 0 : i32
    %c0_i32_0 = arith.constant 0 : i32
    %c0_i32_1 = arith.constant 0 : i32
    return %arg1, %c0_i32, %c0_i32_0 : i32, i32, i32
  }
  func.func @transform_15(%arg0: i32, %arg1: i32) -> (i32, i32, i32) {
    %c0_i32 = arith.constant 0 : i32
    %c0_i32_0 = arith.constant 0 : i32
    %c0_i32_1 = arith.constant 0 : i32
    return %arg1, %c0_i32, %c0_i32_0 : i32, i32, i32
  }
  func.func @transform_16(%arg0: i32, %arg1: i32) -> (i32, i32, i32) {
    %c0_i32 = arith.constant 0 : i32
    %c0_i32_0 = arith.constant 0 : i32
    %c0_i32_1 = arith.constant 0 : i32
    return %arg1, %c0_i32, %c0_i32_0 : i32, i32, i32
  }
  func.func @transform_17(%arg0: i32, %arg1: i32) -> (i32, i32, i32) {
    %c0_i32 = arith.constant 0 : i32
    %c0_i32_0 = arith.constant 0 : i32
    %c0_i32_1 = arith.constant 0 : i32
    return %arg1, %c0_i32, %c0_i32_0 : i32, i32, i32
  }
  func.func @transform_18(%arg0: i32, %arg1: i32) -> (i32, i32, i32) {
    %c0_i32 = arith.constant 0 : i32
    %c0_i32_0 = arith.constant 0 : i32
    %c0_i32_1 = arith.constant 0 : i32
    return %arg1, %c0_i32, %c0_i32_0 : i32, i32, i32
  }
  func.func @transform_19(%arg0: i32, %arg1: i32) -> (i32, i32, i32) {
    %c0_i32 = arith.constant 0 : i32
    %c0_i32_0 = arith.constant 0 : i32
    %c0_i32_1 = arith.constant 0 : i32
    return %arg0, %c0_i32, %c0_i32_0 : i32, i32, i32
  }
}

</mosaic_0001>

<bundles_post_ra>
// kernel: clip_text_forward.1
= control target key start
LH: loop header
LB: loop body
LE: loop exit
PB: predicated region body
PF: predicated region fallthrough
CT: control target
= control target key end

     0   :  { %s4050_s0 = inlined_call_operand.vmem [shape: f32[2,8,32], index: 0, kind: input, shape index: {}]   ;;  %s4051_s1 = inlined_call_operand.vmem [shape: f32[1,32], index: 1, kind: input, shape index: {}]   ;;  %s4052_s2 = inlined_call_operand.vmem [shape: f32[1,32], index: 2, kind: input, shape index: {}]   ;;  %s4053_s3 = inlined_call_operand.vmem [shape: f32[2,1,32], index: 3, kind: input, shape index: {}]   ;;  %s4054_s4 = inlined_call_operand.vmem [shape: f32[2,1,32], index: 4, kind: input, shape index: {}]   ;;  %s4055_s5 = inlined_call_operand.vmem [shape: bf16[2,4,32,8], index: 5, kind: input, shape index: {}]   ;;  %s4056_s6 = inlined_call_operand.vmem [shape: f32[2,4,1,8], index: 6, kind: input, shape index: {}]   ;;  %s4057_s7 = inlined_call_operand.vmem [shape: bf16[2,4,32,8], index: 7, kind: input, shape index: {}]   ;;  %s4058_s8 = inlined_call_operand.vmem [shape: f32[2,4,1,8], index: 8, kind: input, shape index: {}]   ;;  %s4059_s9 = inlined_call_operand.vmem [shape: bf16[2,4,32,8], index: 9, kind: input, shape index: {}]   ;;  %s4060_s10 = inlined_call_operand.vmem [shape: f32[2,4,1,8], index: 10, kind: input, shape index: {}]   ;;  %s4061_s11 = inlined_call_operand.vmem [shape: bf16[2,4,8,32], index: 11, kind: input, shape index: {}]   ;;  %s4062_s12 = inlined_call_operand.vmem [shape: f32[2,1,32], index: 12, kind: input, shape index: {}]   ;;  %s4063_s13 = inlined_call_operand.vmem [shape: f32[2,1,32], index: 13, kind: input, shape index: {}]   ;;  %s4064_s14 = inlined_call_operand.vmem [shape: f32[2,1,32], index: 14, kind: input, shape index: {}]   ;;  %s4065_s15 = inlined_call_operand.vmem [shape: bf16[2,32,64], index: 15, kind: input, shape index: {}]   ;;  %s4066_s16 = inlined_call_operand.vmem [shape: f32[2,1,64], index: 16, kind: input, shape index: {}]   ;;  %s4067_s17 = inlined_call_operand.vmem [shape: bf16[2,64,32], index: 17, kind: input, shape index: {}]   ;;  %s4068_s18 = inlined_call_operand.vmem [shape: f32[2,1,32], index: 18, kind: input, shape index: {}]   ;;  %s4069_s19 = inlined_call_operand.hbm [shape: f32[2,8,32], index: 19, kind: output, shape index: {}]  }
   0x1   :  { %4087 = sst [smem:[#allocation21_spill]] %s4050_s0 }
   0x2   :  { %4088 = sst [smem:[#allocation22_spill]] %s4051_s1 }
   0x3   :  { %4089 = sst [smem:[#allocation23_spill]] %s4052_s2 }
   0x4   :  { %4090 = sst [smem:[#allocation24_spill]] %s4053_s3 }
   0x5   :  { %4091 = sst [smem:[#allocation25_spill]] %s4055_s5 }
   0x6   :  { %4092 = sst [smem:[#allocation26_spill]] %s4056_s6 }
   0x7   :  { %4093 = sst [smem:[#allocation27_spill]] %s4057_s7 }
   0x8   :  { %4094 = sst [smem:[#allocation28_spill]] %s4058_s8 }
   0x9   :  { %4095 = sst [smem:[#allocation29_spill]] %s4059_s9 }
   0xa   :  { %4096 = sst [smem:[#allocation30_spill]] %s4060_s10 }
   0xb   :  { %4097 = sst [smem:[#allocation31_spill]] %s4061_s11 }
   0xc   :  { %4098 = sst [smem:[#allocation32_spill]] %s4062_s12 }
   0xd   :  { %4099 = sst [smem:[#allocation33_spill]] %s4063_s13 }
   0xe   :  { %4100 = sst [smem:[#allocation34_spill]] %s4067_s17 }
   0xf   :  { %4101 = sst [smem:[#allocation35_spill]] %s4068_s18 }
  0x10   :  { %4102 = sst [smem:[#allocation36_spill]] %s4069_s19 }
  0x11   :  { %24 = vsyncpa [#allocation4], 0 }
  0x12   :  { %26 = vsyncpa [#allocation4 + $0x1], 0  ;;  %s3568_s0 = smov 0   ;;  %s3570_s30 = smov 0  }
  0x13   :  { %s3572_s20 = smov 0   ;;  %s3574_s21 = smov 0  }
  0x14   :  { %s3576_s1 = smov 0   ;;  %s3578_s22 = smov 0  }
  0x15   :  { %s3580_s2 = smov 0   ;;  %s3582_s23 = smov 0  }
  0x16 LB: > { %4103 = sst [smem:[#allocation6_spill]] %s3434_s0  ;;  %s2822_s24 = sadd.s32 4294967295, %s3462_s23   ;;  %s3462_s23 = sphi %s3582_s23, %s32_s23   ;;  %s3458_s2 = sphi %s3580_s2, %s4162_s2   ;;  %s3454_s22 = sphi %s3578_s22, %s4161_s22   ;;  %s3450_s1 = sphi %s3576_s1, %s4160_s1   ;;  %s3446_s21 = sphi %s3574_s21, %s4159_s21   ;;  %s3442_s20 = sphi %s3572_s20, %s4158_s20   ;;  %s3438_s30 = sphi %s3570_s30, %s4157_s30   ;;  %s3434_s0 = sphi %s3568_s0, %s4156_s0  }
  0x17   : > { %4104 = sst [smem:[#allocation7_spill]] %s3438_s30  ;;  %s2823_s25 = sadd.s32 4294967294, %s3462_s23  }
  0x18   : > { %4105 = sst [smem:[#allocation8_spill]] %s3442_s20  ;;  %s41_s3 = sadd.s32 1, %s3454_s22 }
  0x19   : > { %4106 = sst [smem:[#allocation9_spill]] %s3446_s21  ;;  %p42_p0 = scmp.ge.s32.totalorder %s41_s3, 2 }
  0x1a   : > { %4107 = sst [smem:[#allocation10_spill]] %s3450_s1  ;;  %s44_s26 = sadd.s32 1, %s3458_s2 }
  0x1b   : > { %4108 = sst [smem:[#allocation11_spill]] %s3454_s22  ;;  %p545_p1 = scmp.ne.s32.totalorder %s3442_s20, %s3438_s30 }
  0x1c   : > { %4109 = sst [smem:[#allocation12_spill]] %s3458_s2  ;;  %p546_p2 = scmp.eq.s32.totalorder %s2822_s24, 3 }
  0x1d   : > { %4110 = sst [smem:[#allocation13_spill]] %s3462_s23  ;;  %s4164_s3 = smov (%p42_p0, %s41_s3), 0 }
  0x1e   : > { %4111 = sst [smem:[#allocation14_spill]] %s4164_s3  ;;  %s4166_s26 = smov (!%p42_p0, %s44_s26), %s3458_s2 }
  0x1f   : > { %p3617_p3 = por %p546_p2, %p545_p1  ;;  %p551_p4 = scmp.ne.s32.totalorder %s3438_s30, %s3434_s0 }
  0x20   : > { %p46_p5 = scmp.ge.s32.totalorder %s4166_s26, 2  ;;  %p552_p6 = scmp.eq.s32.totalorder %s2823_s25, 3 }
  0x21   : > { %s4112_s27 = scalar_select %p3617_p3, 1, 0 }
  0x22   : > { %p2826_p7 = scmp.ge.s32.totalorder %s3462_s23, 1  ;;  %p694_p8 = scmp.lt.s32.totalorder %s3462_s23, 5 }
  0x23   : > { %4113 = sst [smem:[#allocation15_spill]] %s4112_s27  ;;  %s4168_s26 = smov (%p46_p5, %s4166_s26), 0 }
  0x24   : > { %4114 = sst [smem:[#allocation16_spill]] %s4168_s26  ;;  %p3627_p9 = por %p552_p6, %p551_p4 }
  0x25   : > { %p695_p10 = pnand %p2826_p7, %p694_p8  ;;  %s532_s29 = ssub.s32 %s3458_s2, %s4168_s26 }
  0x26   : > { %s4115_s28 = scalar_select %p3627_p9, 1, 0 }
  0x27   : > { %s535_s24 = sadd.s32 1, %s3442_s20  ;;  %p533_p11 = scmp.eq.s32.totalorder %s532_s29, 0 }
  0x28   : > { %4116 = sst [smem:[#allocation17_spill]] %s4115_s28  ;;  %698 = sbr.rel (%p695_p10) target bundleno = 5408 (0x1520), region = 96 }
  0x29   : > { %s3635_s3 = scalar_select %p533_p11, %s3442_s20, %s535_s24  }
  0x2b   : > { %4117 = sst [smem:[#allocation18_spill]] %s3635_s3 }
  0x2f   : > { %s4076_s25 = sand.u32 1, %s3438_s30   ;;  %p812_p12 = scmp.lt.s32.totalorder %s3450_s1, 1 }
  0x30   : > { %s3641_s22 = sshll.u32 %s4076_s25, 3  ;;  %p816_p13 = scmp.lt.s32.totalorder %s3446_s21, 1 }
  0x31   : > { %s813_s28 = scalar_select %p812_p12, %s3450_s1, 1 }
  0x32   : > { %s3646_s0 = scalar_select %p816_p13, %s3446_s21, 1 }
  0x33   : > { %s2828_s29 = sshll.u32 %s813_s28, 3  ;;  %s4118_s2 = sld [smem:[#allocation21_spill]] }
  0x34   : > { %s2976_s21 = sshll.u32 %s3646_s0, 6  ;;  %s4120_s5 = sld [smem:[#allocation25_spill]] }
  0x35   : > { %s2831_s26 = sshll.u32 %s3646_s0, 2  ;;  %s4121_s6 = sld [smem:[#allocation26_spill]] }
  0x36   : > { %s4123_s7 = sld [smem:[#allocation27_spill]]  ;;  %s4124_s8 = sld [smem:[#allocation28_spill]] }
  0x37   : > { %s4126_s9 = sld [smem:[#allocation29_spill]]  ;;  %s4127_s10 = sld [smem:[#allocation30_spill]] }
  0x38   : > { %s4128_s11 = sld [smem:[#allocation31_spill]]  ;;  %s811_s17 = scalar_lea.vmem [#allocation3], %s3641_s22 }
  0x39   : > { %s815_s3 = scalar_lea.vmem %s4118_s2, %s2828_s29  ;;  %s4131_s29 = sld [smem:[#allocation35_spill]] }
  0x3a   : > { %s3663_s28 = scalar_lea.vmem %s4120_s5, %s2976_s21  ;;  %s862_s5 = scalar_lea.vmem %s4064_s14, %s3646_s0 }
  0x3b   : > { %s3669_s20 = scalar_lea.vmem %s4121_s6, %s2831_s26  ;;  %s2979_s6 = sshll.u32 %s3646_s0, 4 }
  0x3c   : > { %4122 = sst [smem:[#allocation19_spill]] %s3669_s20  ;;  %s3674_s30 = scalar_lea.vmem %s4123_s7, %s2976_s21 }
  0x3d   : > { %s3679_s1 = scalar_lea.vmem %s4124_s8, %s2831_s26  ;;  %s3684_s19 = scalar_lea.vmem %s4126_s9, %s2976_s21 }
  0x3e   : > { %4125 = sst [smem:[#allocation20_spill]] %s3679_s1  ;;  %s3689_s2 = scalar_lea.vmem %s4127_s10, %s2831_s26 }
  0x3f   : > { %s3695_s25 = scalar_lea.vmem %s4128_s11, %s2979_s6  ;;  %s3712_s9 = scalar_lea.vmem %s4065_s15, %s2979_s6 }
  0x40   : > { %s870_s10 = scalar_lea.vmem %s4066_s16, %s3646_s0  ;;  %s2981_s11 = sshll.u32 %s3646_s0, 5 }
  0x41   : > { %s878_s12 = scalar_lea.vmem %s4131_s29, %s3646_s0  ;;  %s4132_s21 = sld [smem:[#allocation34_spill]] }
  0x42   : > { %s4133_s18 = sld [smem:[#allocation9_spill]] }
  0x47   : > { %s3726_s13 = scalar_lea.vmem %s4132_s21, %s2981_s11 }
  0x48   : > { %p2844_p0 = scmp.ne.s32.totalorder %s4133_s18, 0 }
  0x49   : > { %v884_v0 = vld [vmem:[%s815_s3] sm:$0xff] (!%p2844_p0)  ;;  %vm885_vm0 = vcmask (!%p2844_p0), 261120  }
  0x4a   : > { %883 = sbr.rel (%p2844_p0) target bundleno = 81 (0x51), region = 100  ;;  %886 = vst.msk [vmem:[#allocation2] sm:$0xff] (!%p2844_p0), %vm885_vm0, %v884_v0 }
  0x51 PF: > { %v3730_v1 = vld [vmem:[#allocation2] sm:$0xff]  ;;  %vm896_vm1 = vcmask 261120   ;;  %v3464_v10 = vmov 0.0   ;;  %v3314_v11 = vld [vmem:[%s3663_s28 + $0x8] sm:$0xff]   ;;  %vm3465_vm2 = vmmov 0   ;;  %s4134_s3 = sld [smem:[#allocation24_spill]]  ;;  %s4136_s24 = scalar_lea.vmem %s4054_s4, %s3646_s0  ;;  %v888_v53 = vlaneseq }
  0x52   : > { %v897_v2 = vsel %vm896_vm1, %v3730_v1, 0.0  ;;  %v3312_v8 = vld [vmem:[%s3663_s28] sm:$0xff]   ;;  %3050 = vmatprep.subr.bf16.mxu0 %v3464_v10  ;;  %3058 = vmatprep.subr.bf16.mxu1 %v3464_v10  ;;  %v3315_v12 = vld [vmem:[%s3674_s30 + $0x8] sm:$0xff]   ;;  %s4137_s20 = sld [smem:[#allocation20_spill]]  ;;  %s4138_s23 = sld [smem:[#allocation19_spill]]  ;;  %vm1121_vm3 = vcmask 64512  }
  0x53   : > { %898 = vadd.xlane.f32.xlu0 %v897_v2  ;;  %v3313_v9 = vld [vmem:[%s3674_s30] sm:$0xff]   ;;  %3051 = vmatpush3.bf16.msra.mxu0 %v3312_v8  ;;  %v3317_v24 = vld [vmem:[%s3684_s19 + $0x8] sm:$0xff]   ;;  %vm1184_vm4 = vcmask 1043456   ;;  %v3318_v45 = vld [vmem:[%s3663_s28 + $0x10] sm:$0xff]   ;;  %v889_v54 = vshrl.u32 %v888_v53, 7  ;;  %v891_v55 = vand.u32 127, %v888_v53 }
  0x54   : > { %3059 = vmatpush3.bf16.msra.mxu1 %v3313_v9  ;;  %3052 = vmatprep.subr.bf16.mxu0 %v3464_v10  ;;  %v2846_v19 = vld [vmem:[%s4136_s24] ss:$0 sm:$0xff]  ;;  %v3319_v50 = vld [vmem:[%s3663_s28 + $0x18] sm:$0xff]   ;;  %v3320_v51 = vld [vmem:[%s3684_s19 + $0x10] sm:$0xff]   ;;  %v3466_v56 = vmov -1e+30  }
  0x55   : > { %3060 = vmatprep.subr.bf16.mxu1 %v3464_v10  ;;  %3054 = vmatprep.mubr.msk.bf16.mxu0 %vm3465_vm2, %v3464_v10  ;;  %v3316_v22 = vld [vmem:[%s3684_s19] sm:$0xff]   ;;  %v3321_v52 = vld [vmem:[%s3684_s19 + $0x18] sm:$0xff]   ;;  %vm892_vm5 = vcmp.le.s32.totalorder %v891_v55, %v889_v54  ;;  %s4141_s27 = sld [smem:[#allocation33_spill]]  ;;  %vm2487_vm6 = vcmask 523264   ;;  %s4144_s11 = sld [smem:[#allocation9_spill]] }
  0x56   : > { %3062 = vmatprep.mubr.msk.bf16.mxu1 %vm3465_vm2, %v3464_v10  ;;  %v2855_v39 = vld [vmem:[%s3689_s2] ss:$0 sm:$0xff]  ;;  %v3804_v57 = vsel %vm892_vm5, 0.0, %v3466_v56  ;;  %v2890_v53 = vld [vmem:[%s3695_s25 + $0x4] sm:$0xf] }
  0x57   : > { %3053 = vmatpush3.bf16.msra.mxu0 %v3314_v11  ;;  %s4135_s29 = scalar_lea.vmem %s4134_s3, %s3646_s0  ;;  %v1540_v54 = vsel %vm1184_vm4, %v2890_v53, 0 }
  0x58   : > { %3061 = vmatpush3.bf16.msra.mxu1 %v3315_v12  ;;  %3066 = vmatprep.subr.bf16.mxu0 %v3464_v10  ;;  %v2845_v17 = vld [vmem:[%s4135_s29] ss:$0 sm:$0xff] }
  0x59   : > { %3074 = vmatprep.subr.bf16.mxu1 %v3464_v10  ;;  %v2851_v25 = vld [vmem:[%s4137_s20] ss:$0 sm:$0xff] }
  0x5a   : > { %v2847_v26 = vld [vmem:[%s4138_s23] ss:$0 sm:$0xff] }
  0x5b   : > { %s4142_s8 = scalar_lea.vmem %s4141_s27, %s3646_s0  ;;  %p2969_p1 = scmp.ne.s32.totalorder %s4144_s11, 1 }
  0x5c   : > { %s4145_s3 = sld [smem:[#allocation22_spill]] (!%p2969_p1)  ;;  %s4146_s26 = sld [smem:[#allocation23_spill]] (!%p2969_p1) }
  0xe0   : > { %v899_v3 = vpop.xlane.xlu0 %898 }
  0xe1   : > { %v901_v4 = vmul.f32 0.03125, %v899_v3 }
  0xe3   : > { %v902_v5 = vsub.f32 %v3730_v1, %v901_v4 }
  0xe5   : > { %v903_v6 = vmul.f32 %v902_v5, %v902_v5 }
  0xe7   : > { %v904_v7 = vsel %vm896_vm1, %v903_v6, 0.0 }
  0xe8   : > { %905 = vadd.xlane.f32.xlu0 %v904_v7 }
 0x175   : > { %v906_v13 = vpop.xlane.xlu0 %905 }
 0x176   : > { %v907_v14 = vmul.f32 0.03125, %v906_v13 }
 0x178   : > { %v908_v15 = vadd.f32 1e-05, %v907_v14 }
 0x17a   : > { %3342 = vrsqrt.f32 %v908_v15 }
 0x184   : > { %v3343_v16 = vpop.eup %3342 }
 0x185   : > { %v910_v18 = vmul.f32 %v3343_v16, %v902_v5  ;;  %v2884_v5 = vld [vmem:[%s3689_s2 + $0x1] ss:$0 sm:$0xff] }
 0x187   : > { %v917_v20 = vmul.f32 %v2845_v17, %v910_v18 }
 0x189   : > { %v924_v21 = vadd.f32 %v2846_v19, %v917_v20 }
 0x18b   : > { %v3761_v23 = vpack.c.bf16 %v924_v21, %v924_v21 }
 0x18d   : > { %3055 = vmatmul.mubr.msk.bf16.vlgmr.msra.gmra.mrb[0].mxu0 %vm896_vm1, %v3761_v23  ;;  %3063 = vmatmul.mubr.msk.bf16.vlgmr.msra.gmra.mrb[0].mxu1 %vm896_vm1, %v3761_v23 }
 0x18e   : > { %3067 = vmatpush3.bf16.msra.mxu0 %v3316_v22  ;;  %3070 = vmatprep.mubr.msk.bf16.mxu0 %vm3465_vm2, %v3464_v10  ;;  %v3322_v22 = vld [vmem:[%s3674_s30 + $0x10] sm:$0xff]  }
 0x18f   : > { %3068 = vmatprep.subr.bf16.mxu0 %v3464_v10  ;;  %3076 = vmatprep.mubr.msk.bf16.mxu1 %vm3465_vm2, %v3464_v10 }
 0x192   : > { %3069 = vmatpush3.bf16.msra.mxu0 %v3317_v24 }
 0x193   : > { %3080 = vmatprep.subr.bf16.mxu0 %v3464_v10 }
 0x195   : > { %3071 = vmatmul.mubr.msk.bf16.vlgmr.msra.gmra.mrb[4].mxu0 %vm896_vm1, %v3761_v23 }
 0x196   : > { %3082 = vmatprep.mubr.msk.bf16.mxu0 %vm3465_vm2, %v3464_v10 }
 0x260   : > { %v986_v27 = vpop.f32.mrb[0].mxu0  ;;  %v1049_v28 = vpop.f32.mrb[0].mxu1 }
 0x261   : > { %v1050_v29 = vadd.f32 %v2851_v25, %v1049_v28  ;;  %v3056_v30 = vpop.f32.mrb[1].mxu0  ;;  %v3064_v31 = vpop.f32.mrb[1].mxu1  ;;  %v987_v34 = vadd.f32 %v2847_v26, %v986_v27  ;;  %v3323_v25 = vld [vmem:[%s3674_s30 + $0x18] sm:$0xff]  }
 0x262   : > { %v989_v32 = vpop.f32.mrb[2].mxu0  ;;  %v1052_v33 = vpop.f32.mrb[2].mxu1  ;;  %v2875_v30 = vld [vmem:[%s4137_s20 + $0x1] ss:$0 sm:$0xff] }
 0x263   : > { %v1120_v35 = vpack.c.bf16 %v1050_v29, %v1050_v29  ;;  %v3057_v36 = vpop.f32.mrb[3].mxu0  ;;  %v3065_v37 = vpop.f32.mrb[3].mxu1  ;;  %v1118_v40 = vmul.f32 0.35355338, %v987_v34  ;;  %v2866_v31 = vld [vmem:[%s4138_s23 + $0x1] ss:$0 sm:$0xff] }
 0x265   : > { %v1126_v38 = vsel %vm1121_vm3, %v1120_v35, 0  ;;  %v1119_v46 = vpack.c.bf16 %v1118_v40, %v1118_v40 }
 0x266   : > { %3075 = vmatpush3.bf16.xpose.msra.mxu1 %v1126_v38 }
 0x267   : > { %3086 = vmatprep.subr.bf16.mxu1 %v3464_v10 }
 0x268   : > { %v1112_v41 = vpop.f32.mrb[4].mxu0 }
 0x269   : > { %v1113_v42 = vadd.f32 %v2855_v39, %v1112_v41  ;;  %v3072_v43 = vpop.f32.mrb[5].mxu0 }
 0x26a   : > { %v1115_v44 = vpop.f32.mrb[6].mxu0 }
 0x26b   : > { %v1180_v47 = vpack.c.bf16 %v1113_v42, %v1113_v42  ;;  %v3073_v48 = vpop.f32.mrb[7].mxu0 }
 0x26d   : > { %v1186_v49 = vsel %vm1184_vm4, %v1180_v47, 0  ;;  %3077 = vmatmul.mubr.msk.bf16.vlgmr.msra.gmra.mrb[4].mxu1 %vm1121_vm3, %v1119_v46 }
 0x26e   : > { %3081 = vmatpush3.bf16.msra.mxu0 %v1186_v49  ;;  %3087 = vmatpush3.bf16.msra.mxu1 %v3318_v45 }
 0x26f   : > { %3088 = vmatprep.subr.bf16.mxu1 %v3464_v10  ;;  %3090 = vmatprep.mubr.msk.bf16.mxu1 %vm3465_vm2, %v3464_v10 }
 0x270   : > { %3094 = vmatprep.subr.bf16.mxu0 %v3464_v10 }
 0x272   : > { %3089 = vmatpush3.bf16.msra.mxu1 %v3319_v50 }
 0x273   : > { %3102 = vmatprep.subr.bf16.mxu1 %v3464_v10 }
 0x275   : > { %3091 = vmatmul.mubr.msk.bf16.vlgmr.msra.gmra.mrb[8].mxu1 %vm896_vm1, %v3761_v23 }
 0x276   : > { %3103 = vmatpush3.bf16.msra.mxu1 %v3320_v51  ;;  %3106 = vmatprep.mubr.msk.bf16.mxu1 %vm3465_vm2, %v3464_v10 }
 0x277   : > { %3104 = vmatprep.subr.bf16.mxu1 %v3464_v10 }
 0x27a   : > { %3105 = vmatpush3.bf16.msra.mxu1 %v3321_v52 }
 0x27b   : > { %3116 = vmatprep.subr.bf16.mxu1 %v3464_v10 }
 0x27d   : > { %3107 = vmatmul.mubr.msk.bf16.vlgmr.msra.gmra.mrb[12].mxu1 %vm896_vm1, %v3761_v23 }
 0x27e   : > { %3118 = vmatprep.mubr.msk.bf16.mxu1 %vm3465_vm2, %v3464_v10 }
 0x340   : > { %v1162_v58 = vpop.f32.mrb[4].mxu1 }
 0x341   : > { %v1163_v59 = vadd.f32 %v1162_v58, %v3804_v57  ;;  %v3078_v60 = vpop.f32.mrb[5].mxu1  ;;  %v1229_v58 = vld [vmem:[%s3695_s25] sm:$0xf] }
 0x342   : > { %v1165_v61 = vpop.f32.mrb[6].mxu1 }
 0x343   : > { %v3079_v62 = vpop.f32.mrb[7].mxu1  ;;  %v1168_v63 = vsel %vm1121_vm3, %v1163_v59, -inf  ;;  %v1586_v61 = vsel %vm1184_vm4, %v1229_v58, 0  ;;  %v2922_v58 = vld [vmem:[%s3695_s25 + $0x8] sm:$0xf] }
 0x344   : > { %1169 = vmax.xlane.f32.xlu1 %v1168_v63  ;;  %v3324_v62 = vld [vmem:[%s3674_s30 + $0x20] sm:$0xff]  }
 0x348   : > { %v1289_v0 = vpop.f32.mrb[8].mxu1 }
 0x349   : > { %v3092_v2 = vpop.f32.mrb[9].mxu1  ;;  %v1290_v36 = vadd.f32 %v2866_v31, %v1289_v0  ;;  %v3325_v0 = vld [vmem:[%s3674_s30 + $0x28] sm:$0xff]  }
 0x34a   : > { %v1292_v3 = vpop.f32.mrb[10].mxu1 }
 0x34b   : > { %v3093_v4 = vpop.f32.mrb[11].mxu1  ;;  %v1425_v40 = vmul.f32 0.35355338, %v1290_v36  ;;  %v3326_v3 = vld [vmem:[%s3663_s28 + $0x20] sm:$0xff]  }
 0x34d   : > { %v1426_v41 = vpack.c.bf16 %v1425_v40, %v1425_v40 }
 0x350   : > { %v1419_v6 = vpop.f32.mrb[12].mxu1 }
 0x351   : > { %v1420_v7 = vadd.f32 %v2884_v5, %v1419_v6  ;;  %v3108_v8 = vpop.f32.mrb[13].mxu1 }
 0x352   : > { %v1422_v9 = vpop.f32.mrb[14].mxu1  ;;  %v3327_v8 = vld [vmem:[%s3663_s28 + $0x28] sm:$0xff]  }
 0x353   : > { %v1486_v11 = vpack.c.bf16 %v1420_v7, %v1420_v7  ;;  %v3109_v12 = vpop.f32.mrb[15].mxu1 }
 0x355   : > { %v1491_v13 = vsel %vm1184_vm4, %v1486_v11, 0  ;;  %v3328_v11 = vld [vmem:[%s3684_s19 + $0x20] sm:$0xff]  }
 0x356   : > { %3117 = vmatpush3.bf16.msra.mxu1 %v1491_v13 }
 0x357   : > { %3128 = vmatprep.subr.bf16.mxu1 %v3464_v10 }
 0x3d1   : > { %v1170_v14 = vpop.xlane.xlu1 %1169 }
 0x3d2   : > { %v1171_v15 = vsub.f32 %v1163_v59, %v1170_v14 }
 0x3d4   : > { %v1172_v16 = vmul.f32 1.442695, %v1171_v15  ;;  %v3329_v15 = vld [vmem:[%s3684_s19 + $0x28] sm:$0xff]  }
 0x3d6   : > { %3344 = vpow2.f32 %v1172_v16  ;;  %v2907_v16 = vld [vmem:[%s4137_s20 + $0x2] ss:$0 sm:$0xff] }
 0x3e0   : > { %v3345_v17 = vpop.eup %3344 }
 0x3e1   : > { %v1174_v18 = vsel %vm1121_vm3, %v3345_v17, 0.0 }
 0x3e2   : > { %1175 = vadd.xlane.f32.xlu1 %v1174_v18 }
 0x46f   : > { %v1176_v19 = vpop.xlane.xlu1 %1175 }
 0x470   : > { %3346 = vrcp.f32 %v1176_v19 }
 0x47a   : > { %v3347_v20 = vpop.eup %3346 }
 0x47b   : > { %v1178_v21 = vmul.f32 %v3347_v20, %v3345_v17 }
 0x47d   : > { %v1179_v24 = vpack.c.bf16 %v1178_v21, %v1178_v21 }
 0x47f   : > { %3083 = vmatmul.mubr.msk.bf16.vlgmr.msra.gmra.mrb[8].mxu0 %vm1121_vm3, %v1179_v24 }
 0x480   : > { %3095 = vmatpush3.bf16.msra.mxu0 %v3322_v22  ;;  %3098 = vmatprep.mubr.msk.bf16.mxu0 %vm3465_vm2, %v3464_v10 }
 0x481   : > { %3096 = vmatprep.subr.bf16.mxu0 %v3464_v10 }
 0x484   : > { %3097 = vmatpush3.bf16.msra.mxu0 %v3323_v25 }
 0x485   : > { %3110 = vmatprep.subr.bf16.mxu0 %v3464_v10 }
 0x487   : > { %3099 = vmatmul.mubr.msk.bf16.vlgmr.msra.gmra.mrb[12].mxu0 %vm896_vm1, %v3761_v23 }
 0x488   : > { %3112 = vmatprep.mubr.msk.bf16.mxu0 %vm3465_vm2, %v3464_v10 }
 0x552   : > { %v1222_v26 = vpop.f32.mrb[8].mxu0 }
 0x553   : > { %v3084_v27 = vpop.f32.mrb[9].mxu0  ;;  %v1228_v63 = vpack.c.bf16 %v1222_v26, %v1222_v26 }
 0x554   : > { %v1225_v28 = vpop.f32.mrb[10].mxu0 }
 0x555   : > { %v3085_v29 = vpop.f32.mrb[11].mxu0 }
 0x55a   : > { %v1354_v32 = vpop.f32.mrb[12].mxu0 }
 0x55b   : > { %v1355_v33 = vadd.f32 %v2875_v30, %v1354_v32  ;;  %v3100_v34 = vpop.f32.mrb[13].mxu0  ;;  %v2898_v30 = vld [vmem:[%s4138_s23 + $0x2] ss:$0 sm:$0xff] }
 0x55c   : > { %v1357_v35 = vpop.f32.mrb[14].mxu0 }
 0x55d   : > { %v1427_v37 = vpack.c.bf16 %v1355_v33, %v1355_v33  ;;  %v3101_v38 = vpop.f32.mrb[15].mxu0 }
 0x55e   : > { %v2916_v38 = vld [vmem:[%s3689_s2 + $0x2] ss:$0 sm:$0xff] }
 0x55f   : > { %v1432_v39 = vsel %vm1121_vm3, %v1427_v37, 0 }
 0x560   : > { %3111 = vmatpush3.bf16.xpose.msra.mxu0 %v1432_v39 }
 0x561   : > { %3122 = vmatprep.subr.bf16.mxu0 %v3464_v10 }
 0x567   : > { %3113 = vmatmul.mubr.msk.bf16.vlgmr.msra.gmra.mrb[16].mxu0 %vm1121_vm3, %v1426_v41 }
 0x568   : > { %3124 = vmatprep.mubr.msk.bf16.mxu0 %vm3465_vm2, %v3464_v10  ;;  %3123 = vmatpush3.bf16.msra.mxu0 %v1540_v54 }
 0x569   : > { %3134 = vmatprep.subr.bf16.mxu0 %v3464_v10 }
 0x63a   : > { %v1468_v42 = vpop.f32.mrb[16].mxu0 }
 0x63b   : > { %v1469_v43 = vadd.f32 %v1468_v42, %v3804_v57  ;;  %v3114_v44 = vpop.f32.mrb[17].mxu0 }
 0x63c   : > { %v1471_v45 = vpop.f32.mrb[18].mxu0 }
 0x63d   : > { %v3115_v46 = vpop.f32.mrb[19].mxu0  ;;  %v1474_v47 = vsel %vm1121_vm3, %v1469_v43, -inf }
 0x63e   : > { %1475 = vmax.xlane.f32.xlu0 %v1474_v47 }
 0x6cb   : > { %v1476_v48 = vpop.xlane.xlu0 %1475 }
 0x6cc   : > { %v1477_v49 = vsub.f32 %v1469_v43, %v1476_v48 }
 0x6ce   : > { %v1478_v50 = vmul.f32 1.442695, %v1477_v49 }
 0x6d0   : > { %3348 = vpow2.f32 %v1478_v50 }
 0x6da   : > { %v3349_v51 = vpop.eup %3348 }
 0x6db   : > { %v1480_v52 = vsel %vm1121_vm3, %v3349_v51, 0.0 }
 0x6dc   : > { %1481 = vadd.xlane.f32.xlu1 %v1480_v52 }
 0x769   : > { %v1482_v55 = vpop.xlane.xlu1 %1481 }
 0x76a   : > { %3350 = vrcp.f32 %v1482_v55 }
 0x774   : > { %v3351_v56 = vpop.eup %3350 }
 0x775   : > { %v1484_v59 = vmul.f32 %v3351_v56, %v3349_v51 }
 0x777   : > { %v1485_v60 = vpack.c.bf16 %v1484_v59, %v1484_v59  ;;  %v1938_v59 = vsel %vm1184_vm4, %v2922_v58, 0 }
 0x779   : > { %3119 = vmatmul.mubr.msk.bf16.vlgmr.msra.gmra.mrb[16].mxu1 %vm1121_vm3, %v1485_v60 }
 0x77a   : > { %3129 = vmatpush3.bf16.msra.mxu1 %v1586_v61  ;;  %3130 = vmatprep.mubr.msk.bf16.mxu1 %vm3465_vm2, %v3464_v10 }
 0x77b   : > { %3142 = vmatprep.subr.bf16.mxu1 %v3464_v10 }
 0x781   : > { %3131 = vmatmul.mubr.msk.bf16.vlgmr.msra.gmra.mrb[20].mxu1 %vm1121_vm3, %v1228_v63  ;;  %v3330_v63 = vld [vmem:[%s3663_s28 + $0x30] sm:$0xff]  }
 0x782   : > { %3143 = vmatpush3.bf16.msra.mxu1 %v3324_v62  ;;  %3146 = vmatprep.mubr.msk.bf16.mxu1 %vm3465_vm2, %v3464_v10 }
 0x783   : > { %3144 = vmatprep.subr.bf16.mxu1 %v3464_v10 }
 0x786   : > { %3145 = vmatpush3.bf16.msra.mxu1 %v3325_v0 }
 0x787   : > { %3158 = vmatprep.subr.bf16.mxu1 %v3464_v10 }
 0x789   : > { %3147 = vmatmul.mubr.msk.bf16.vlgmr.msra.gmra.mrb[24].mxu1 %vm896_vm1, %v3761_v23 }
 0x78a   : > { %3160 = vmatprep.mubr.msk.bf16.mxu1 %vm3465_vm2, %v3464_v10 }
 0x84c   : > { %v1527_v2 = vpop.f32.mrb[16].mxu1 }
 0x84d   : > { %v1533_v4 = vpack.c.bf16 %v1527_v2, %v1527_v2  ;;  %v3120_v5 = vpop.f32.mrb[17].mxu1  ;;  %v3331_v2 = vld [vmem:[%s3663_s28 + $0x38] sm:$0xff]  }
 0x84e   : > { %v1530_v6 = vpop.f32.mrb[18].mxu1 }
 0x84f   : > { %v3121_v7 = vpop.f32.mrb[19].mxu1  ;;  %3125 = vmatmul.mubr.msk.bf16.vlgmr.msra.gmra.mrb[20].mxu0 %vm1121_vm3, %v1533_v4  ;;  %v3333_v4 = vld [vmem:[%s3684_s19 + $0x38] sm:$0xff]   ;;  %v3334_v6 = vld [vmem:[%s3674_s30 + $0x30] sm:$0xff]  }
 0x850   : > { %3135 = vmatpush3.bf16.msra.mxu0 %v3326_v3  ;;  %3138 = vmatprep.mubr.msk.bf16.mxu0 %vm3465_vm2, %v3464_v10  ;;  %v3332_v3 = vld [vmem:[%s3684_s19 + $0x30] sm:$0xff]  }
 0x851   : > { %3136 = vmatprep.subr.bf16.mxu0 %v3464_v10 }
 0x854   : > { %v1622_v9 = vpop.f32.mrb[20].mxu1  ;;  %3137 = vmatpush3.bf16.msra.mxu0 %v3327_v8 }
 0x855   : > { %v3132_v12 = vpop.f32.mrb[21].mxu1  ;;  %3150 = vmatprep.subr.bf16.mxu0 %v3464_v10 }
 0x856   : > { %v1625_v13 = vpop.f32.mrb[22].mxu1  ;;  %v3335_v12 = vld [vmem:[%s3674_s30 + $0x38] sm:$0xff]   ;;  %s4139_s30 = sld [smem:[#allocation32_spill]] }
 0x857   : > { %v3133_v14 = vpop.f32.mrb[23].mxu1  ;;  %3139 = vmatmul.mubr.msk.bf16.vlgmr.msra.gmra.mrb[24].mxu0 %vm896_vm1, %v3761_v23 }
 0x858   : > { %3151 = vmatpush3.bf16.msra.mxu0 %v3328_v11  ;;  %3154 = vmatprep.mubr.msk.bf16.mxu0 %vm3465_vm2, %v3464_v10 }
 0x859   : > { %3152 = vmatprep.subr.bf16.mxu0 %v3464_v10 }
 0x85c   : > { %v1752_v17 = vpop.f32.mrb[24].mxu1  ;;  %3153 = vmatpush3.bf16.msra.mxu0 %v3329_v15 }
 0x85d   : > { %v1753_v18 = vadd.f32 %v2907_v16, %v1752_v17  ;;  %v3148_v19 = vpop.f32.mrb[25].mxu1  ;;  %3164 = vmatprep.subr.bf16.mxu0 %v3464_v10  ;;  %v2947_v17 = vld [vmem:[%s3689_s2 + $0x3] ss:$0 sm:$0xff]  ;;  %s4140_s2 = scalar_lea.vmem %s4139_s30, %s3646_s0 }
 0x85e   : > { %v1755_v20 = vpop.f32.mrb[26].mxu1 }
 0x85f   : > { %v1825_v21 = vpack.c.bf16 %v1753_v18, %v1753_v18  ;;  %v3149_v22 = vpop.f32.mrb[27].mxu1  ;;  %3155 = vmatmul.mubr.msk.bf16.vlgmr.msra.gmra.mrb[28].mxu0 %vm896_vm1, %v3761_v23 }
 0x860   : > { %3166 = vmatprep.mubr.msk.bf16.mxu0 %vm3465_vm2, %v3464_v10 }
 0x861   : > { %v1830_v24 = vsel %vm1121_vm3, %v1825_v21, 0 }
 0x862   : > { %3159 = vmatpush3.bf16.xpose.msra.mxu1 %v1830_v24 }
 0x863   : > { %3170 = vmatprep.subr.bf16.mxu1 %v3464_v10 }
 0x922   : > { %v1576_v25 = vpop.f32.mrb[20].mxu0 }
 0x923   : > { %v3875_v26 = vadd.f32 %v1622_v9, %v1576_v25  ;;  %v3126_v27 = vpop.f32.mrb[21].mxu0 }
 0x924   : > { %v1579_v28 = vpop.f32.mrb[22].mxu0 }
 0x925   : > { %v3127_v29 = vpop.f32.mrb[23].mxu0 }
 0x92a   : > { %v1687_v31 = vpop.f32.mrb[24].mxu0 }
 0x92b   : > { %v1688_v32 = vadd.f32 %v2898_v30, %v1687_v31  ;;  %v3140_v33 = vpop.f32.mrb[25].mxu0  ;;  %v2938_v31 = vld [vmem:[%s4137_s20 + $0x3] ss:$0 sm:$0xff] }
 0x92c   : > { %v1690_v34 = vpop.f32.mrb[26].mxu0 }
 0x92d   : > { %v1823_v35 = vmul.f32 0.35355338, %v1688_v32  ;;  %v3141_v36 = vpop.f32.mrb[27].mxu0  ;;  %v2929_v32 = vld [vmem:[%s4138_s23 + $0x3] ss:$0 sm:$0xff] }
 0x92f   : > { %v1824_v37 = vpack.c.bf16 %v1823_v35, %v1823_v35 }
 0x931   : > { %3161 = vmatmul.mubr.msk.bf16.vlgmr.msra.gmra.mrb[28].mxu1 %vm1121_vm3, %v1824_v37 }
 0x932   : > { %v1817_v39 = vpop.f32.mrb[28].mxu0  ;;  %3172 = vmatprep.mubr.msk.bf16.mxu1 %vm3465_vm2, %v3464_v10  ;;  %3171 = vmatpush3.bf16.msra.mxu1 %v1938_v59 }
 0x933   : > { %v1818_v40 = vadd.f32 %v2916_v38, %v1817_v39  ;;  %v3156_v41 = vpop.f32.mrb[29].mxu0  ;;  %3184 = vmatprep.subr.bf16.mxu1 %v3464_v10 }
 0x934   : > { %v1820_v42 = vpop.f32.mrb[30].mxu0 }
 0x935   : > { %v1884_v43 = vpack.c.bf16 %v1818_v40, %v1818_v40  ;;  %v3157_v44 = vpop.f32.mrb[31].mxu0 }
 0x937   : > { %v1889_v45 = vsel %vm1184_vm4, %v1884_v43, 0 }
 0x938   : > { %3165 = vmatpush3.bf16.msra.mxu0 %v1889_v45 }
 0x939   : > { %3176 = vmatprep.subr.bf16.mxu0 %v3464_v10 }
 0xa04   : > { %v1866_v46 = vpop.f32.mrb[28].mxu1 }
 0xa05   : > { %v1867_v47 = vadd.f32 %v1866_v46, %v3804_v57  ;;  %v3162_v48 = vpop.f32.mrb[29].mxu1 }
 0xa06   : > { %v1869_v49 = vpop.f32.mrb[30].mxu1 }
 0xa07   : > { %v3163_v50 = vpop.f32.mrb[31].mxu1  ;;  %v1872_v51 = vsel %vm1121_vm3, %v1867_v47, -inf }
 0xa08   : > { %1873 = vmax.xlane.f32.xlu0 %v1872_v51 }
 0xa95   : > { %v1874_v52 = vpop.xlane.xlu0 %1873 }
 0xa96   : > { %v1875_v53 = vsub.f32 %v1867_v47, %v1874_v52 }
 0xa98   : > { %v1876_v54 = vmul.f32 1.442695, %v1875_v53  ;;  %v2953_v53 = vld [vmem:[%s3695_s25 + $0xc] sm:$0xf] }
 0xa9a   : > { %3352 = vpow2.f32 %v1876_v54  ;;  %v2291_v54 = vsel %vm1184_vm4, %v2953_v53, 0 }
 0xaa4   : > { %v3353_v55 = vpop.eup %3352 }
 0xaa5   : > { %v1878_v56 = vsel %vm1121_vm3, %v3353_v55, 0.0 }
 0xaa6   : > { %1879 = vadd.xlane.f32.xlu1 %v1878_v56 }
 0xb33   : > { %v1880_v60 = vpop.xlane.xlu1 %1879 }
 0xb34   : > { %3354 = vrcp.f32 %v1880_v60 }
 0xb3e   : > { %v3355_v61 = vpop.eup %3354 }
 0xb3f   : > { %v1882_v62 = vmul.f32 %v3355_v61, %v3353_v55 }
 0xb41   : > { %v1883_v0 = vpack.c.bf16 %v1882_v62, %v1882_v62 }
 0xb43   : > { %3167 = vmatmul.mubr.msk.bf16.vlgmr.msra.gmra.mrb[32].mxu0 %vm1121_vm3, %v1883_v0 }
 0xb44   : > { %3177 = vmatpush3.bf16.msra.mxu0 %v3330_v63  ;;  %3180 = vmatprep.mubr.msk.bf16.mxu0 %vm3465_vm2, %v3464_v10 }
 0xb45   : > { %3178 = vmatprep.subr.bf16.mxu0 %v3464_v10 }
 0xb48   : > { %3179 = vmatpush3.bf16.msra.mxu0 %v3331_v2 }
 0xb49   : > { %3192 = vmatprep.subr.bf16.mxu0 %v3464_v10 }
 0xb4b   : > { %3181 = vmatmul.mubr.msk.bf16.vlgmr.msra.gmra.mrb[36].mxu0 %vm896_vm1, %v3761_v23 }
 0xb4c   : > { %3193 = vmatpush3.bf16.msra.mxu0 %v3332_v3  ;;  %3196 = vmatprep.mubr.msk.bf16.mxu0 %vm3465_vm2, %v3464_v10 }
 0xb4d   : > { %3194 = vmatprep.subr.bf16.mxu0 %v3464_v10 }
 0xb50   : > { %3195 = vmatpush3.bf16.msra.mxu0 %v3333_v4  ;;  %v2955_v4 = vld [vmem:[%s4140_s2] ss:$0 sm:$0xff] }
 0xb51   : > { %3206 = vmatprep.subr.bf16.mxu0 %v3464_v10 }
 0xb53   : > { %3197 = vmatmul.mubr.msk.bf16.vlgmr.msra.gmra.mrb[40].mxu0 %vm896_vm1, %v3761_v23 }
 0xb54   : > { %3208 = vmatprep.mubr.msk.bf16.mxu0 %vm3465_vm2, %v3464_v10 }
 0xc16   : > { %v1925_v5 = vpop.f32.mrb[32].mxu0 }
 0xc17   : > { %v1931_v7 = vpack.c.bf16 %v1925_v5, %v1925_v5  ;;  %v3168_v8 = vpop.f32.mrb[33].mxu0 }
 0xc18   : > { %v1928_v9 = vpop.f32.mrb[34].mxu0 }
 0xc19   : > { %v3169_v11 = vpop.f32.mrb[35].mxu0  ;;  %3173 = vmatmul.mubr.msk.bf16.vlgmr.msra.gmra.mrb[32].mxu1 %vm1121_vm3, %v1931_v7 }
 0xc1a   : > { %3185 = vmatpush3.bf16.msra.mxu1 %v3334_v6  ;;  %3188 = vmatprep.mubr.msk.bf16.mxu1 %vm3465_vm2, %v3464_v10 }
 0xc1b   : > { %3186 = vmatprep.subr.bf16.mxu1 %v3464_v10 }
 0xc1e   : > { %v2040_v13 = vpop.f32.mrb[36].mxu0  ;;  %3187 = vmatpush3.bf16.msra.mxu1 %v3335_v12 }
 0xc1f   : > { %v3182_v14 = vpop.f32.mrb[37].mxu0  ;;  %3200 = vmatprep.subr.bf16.mxu1 %v3464_v10  ;;  %v2041_v37 = vadd.f32 %v2929_v32, %v2040_v13  ;;  %v2958_v32 = vld [vmem:[%s870_s10] ss:$0 sm:$0xff] }
 0xc20   : > { %v2043_v15 = vpop.f32.mrb[38].mxu0 }
 0xc21   : > { %v3183_v16 = vpop.f32.mrb[39].mxu0  ;;  %3189 = vmatmul.mubr.msk.bf16.vlgmr.msra.gmra.mrb[36].mxu1 %vm896_vm1, %v3761_v23  ;;  %v2176_v41 = vmul.f32 0.35355338, %v2041_v37 }
 0xc22   : > { %3202 = vmatprep.mubr.msk.bf16.mxu1 %vm3465_vm2, %v3464_v10  ;;  %v3336_v16 = vld [vmem:[%s3712_s9] sm:$0xff]  }
 0xc23   : > { %v2177_v42 = vpack.c.bf16 %v2176_v41, %v2176_v41 }
 0xc26   : > { %v2170_v18 = vpop.f32.mrb[40].mxu0 }
 0xc27   : > { %v2171_v19 = vadd.f32 %v2947_v17, %v2170_v18  ;;  %v3198_v20 = vpop.f32.mrb[41].mxu0 }
 0xc28   : > { %v2173_v21 = vpop.f32.mrb[42].mxu0 }
 0xc29   : > { %v2237_v22 = vpack.c.bf16 %v2171_v19, %v2171_v19  ;;  %v3199_v24 = vpop.f32.mrb[43].mxu0  ;;  %v2956_v21 = vld [vmem:[%s4142_s8] ss:$0 sm:$0xff] }
 0xc2a   : > { %v2957_v24 = vld [vmem:[%s862_s5] ss:$0 sm:$0xff] }
 0xc2b   : > { %v2242_v25 = vsel %vm1184_vm4, %v2237_v22, 0 }
 0xc2c   : > { %3207 = vmatpush3.bf16.msra.mxu0 %v2242_v25 }
 0xc2d   : > { %3218 = vmatprep.subr.bf16.mxu0 %v3464_v10 }
 0xcec   : > { %v1974_v27 = vpop.f32.mrb[32].mxu1 }
 0xced   : > { %v1980_v23 = vadd.f32 %v1974_v27, %v3875_v26  ;;  %v3174_v28 = vpop.f32.mrb[33].mxu1 }
 0xcee   : > { %v1977_v29 = vpop.f32.mrb[34].mxu1  ;;  %v3338_v28 = vld [vmem:[%s3726_s13] sm:$0xff]  }
 0xcef   : > { %v3175_v30 = vpop.f32.mrb[35].mxu1  ;;  %v3339_v29 = vld [vmem:[%s3726_s13 + $0x8] sm:$0xff]  }
 0xcf0   : > { %v3340_v30 = vld [vmem:[%s3726_s13 + $0x10] sm:$0xff]  }
 0xcf4   : > { %v2105_v33 = vpop.f32.mrb[36].mxu1 }
 0xcf5   : > { %v2106_v34 = vadd.f32 %v2938_v31, %v2105_v33  ;;  %v3190_v35 = vpop.f32.mrb[37].mxu1  ;;  %v3341_v31 = vld [vmem:[%s3726_s13 + $0x18] sm:$0xff]  }
 0xcf6   : > { %v2108_v36 = vpop.f32.mrb[38].mxu1 }
 0xcf7   : > { %v2178_v38 = vpack.c.bf16 %v2106_v34, %v2106_v34  ;;  %v3191_v39 = vpop.f32.mrb[39].mxu1 }
 0xcf9   : > { %v2183_v40 = vsel %vm1121_vm3, %v2178_v38, 0 }
 0xcfa   : > { %3201 = vmatpush3.bf16.xpose.msra.mxu1 %v2183_v40 }
 0xcfb   : > { %3212 = vmatprep.subr.bf16.mxu1 %v3464_v10 }
 0xd01   : > { %3203 = vmatmul.mubr.msk.bf16.vlgmr.msra.gmra.mrb[40].mxu1 %vm1121_vm3, %v2177_v42 }
 0xd02   : > { %3214 = vmatprep.mubr.msk.bf16.mxu1 %vm3465_vm2, %v3464_v10  ;;  %3213 = vmatpush3.bf16.msra.mxu1 %v2291_v54 }
 0xd03   : > { %3226 = vmatprep.subr.bf16.mxu1 %v3464_v10 }
 0xdd4   : > { %v2219_v26 = vpop.f32.mrb[40].mxu1 }
 0xdd5   : > { %v2220_v43 = vadd.f32 %v2219_v26, %v3804_v57  ;;  %v3204_v44 = vpop.f32.mrb[41].mxu1 }
 0xdd6   : > { %v2222_v45 = vpop.f32.mrb[42].mxu1 }
 0xdd7   : > { %v3205_v46 = vpop.f32.mrb[43].mxu1  ;;  %v2225_v47 = vsel %vm1121_vm3, %v2220_v43, -inf }
 0xdd8   : > { %2226 = vmax.xlane.f32.xlu0 %v2225_v47 }
 0xe65   : > { %v2227_v48 = vpop.xlane.xlu0 %2226 }
 0xe66   : > { %v2228_v49 = vsub.f32 %v2220_v43, %v2227_v48  ;;  %v2963_v43 = vld [vmem:[%s878_s12] ss:$0 sm:$0xff] }
 0xe68   : > { %v2229_v50 = vmul.f32 1.442695, %v2228_v49 }
 0xe6a   : > { %3356 = vpow2.f32 %v2229_v50 }
 0xe74   : > { %v3357_v51 = vpop.eup %3356 }
 0xe75   : > { %v2231_v52 = vsel %vm1121_vm3, %v3357_v51, 0.0 }
 0xe76   : > { %2232 = vadd.xlane.f32.xlu1 %v2231_v52 }
 0xf03   : > { %v2233_v57 = vpop.xlane.xlu1 %2232 }
 0xf04   : > { %3358 = vrcp.f32 %v2233_v57 }
 0xf0e   : > { %v3359_v55 = vpop.eup %3358 }
 0xf0f   : > { %v2235_v56 = vmul.f32 %v3359_v55, %v3357_v51 }
 0xf11   : > { %v2236_v58 = vpack.c.bf16 %v2235_v56, %v2235_v56 }
 0xf13   : > { %3209 = vmatmul.mubr.msk.bf16.vlgmr.msra.gmra.mrb[44].mxu0 %vm1121_vm3, %v2236_v58 }
 0xf14   : > { %3222 = vmatprep.mubr.msk.bf16.mxu0 %vm3465_vm2, %v3464_v10  ;;  %3219 = vmatpush3.bf16.msra.mxu0 %v3336_v16 }
 0xf15   : > { %3220 = vmatprep.subr.bf16.mxu0 %v3464_v10 }
 0xfe6   : > { %v2278_v59 = vpop.f32.mrb[44].mxu0 }
 0xfe7   : > { %v2284_v60 = vpack.c.bf16 %v2278_v59, %v2278_v59  ;;  %v3210_v61 = vpop.f32.mrb[45].mxu0 }
 0xfe8   : > { %v2281_v62 = vpop.f32.mrb[46].mxu0 }
 0xfe9   : > { %v3211_v63 = vpop.f32.mrb[47].mxu0  ;;  %3215 = vmatmul.mubr.msk.bf16.vlgmr.msra.gmra.mrb[44].mxu1 %vm1121_vm3, %v2284_v60  ;;  %v2970_v60 = vld [vmem:[%s4145_s3] ss:$0 sm:$0xff] (!%p2969_p1) }
 0xfea   : > { %3234 = vmatprep.mubr.msk.bf16.mxu1 %vm3465_vm2, %v3464_v10  ;;  %3227 = vmatpush3.bf16.msra.mxu1 %v3338_v28  ;;  %v2971_v62 = vld [vmem:[%s4146_s26] ss:$0 sm:$0xff] (!%p2969_p1) }
 0xfeb   : > { %3228 = vmatprep.subr.bf16.mxu1 %v3464_v10 }
 0xfee   : > { %3229 = vmatpush3.bf16.msra.mxu1 %v3339_v29 }
 0xfef   : > { %3230 = vmatprep.subr.bf16.mxu1 %v3464_v10 }
 0xff2   : > { %3231 = vmatpush3.bf16.msra.mxu1 %v3340_v30 }
 0xff3   : > { %3232 = vmatprep.subr.bf16.mxu1 %v3464_v10 }
 0xff6   : > { %3233 = vmatpush3.bf16.msra.mxu1 %v3341_v31 }
0x10bc   : > { %v2327_v0 = vpop.f32.mrb[44].mxu1 }
0x10bd   : > { %v2333_v2 = vadd.f32 %v2327_v0, %v1980_v23  ;;  %v3216_v3 = vpop.f32.mrb[45].mxu1 }
0x10be   : > { %v2330_v5 = vpop.f32.mrb[46].mxu1 }
0x10bf   : > { %v2334_v6 = vadd.f32 %v2333_v2, %v3730_v1  ;;  %v3217_v7 = vpop.f32.mrb[47].mxu1  ;;  %v3337_v1 = vld [vmem:[%s3712_s9 + $0x8] sm:$0xff]  }
0x10c0   : > { %3221 = vmatpush3.bf16.msra.mxu0 %v3337_v1 }
0x10c1   : > { %v2342_v8 = vadd.f32 %v2955_v4, %v2334_v6 }
0x10c3   : > { %v2345_v9 = vsel %vm896_vm1, %v2342_v8, 0.0 }
0x10c4   : > { %2346 = vadd.xlane.f32.xlu0 %v2345_v9 }
0x1151   : > { %v2347_v11 = vpop.xlane.xlu0 %2346 }
0x1152   : > { %v2348_v12 = vmul.f32 0.03125, %v2347_v11 }
0x1154   : > { %v2349_v13 = vsub.f32 %v2342_v8, %v2348_v12 }
0x1156   : > { %v2350_v14 = vmul.f32 %v2349_v13, %v2349_v13 }
0x1158   : > { %v2351_v15 = vsel %vm896_vm1, %v2350_v14, 0.0 }
0x1159   : > { %2352 = vadd.xlane.f32.xlu1 %v2351_v15 }
0x11e6   : > { %v2353_v17 = vpop.xlane.xlu1 %2352 }
0x11e7   : > { %v2354_v18 = vmul.f32 0.03125, %v2353_v17 }
0x11e9   : > { %v2355_v19 = vadd.f32 1e-05, %v2354_v18 }
0x11eb   : > { %3360 = vrsqrt.f32 %v2355_v19 }
0x11f5   : > { %v3361_v20 = vpop.eup %3360 }
0x11f6   : > { %v2357_v22 = vmul.f32 %v3361_v20, %v2349_v13 }
0x11f8   : > { %v2364_v25 = vmul.f32 %v2956_v21, %v2357_v22 }
0x11fa   : > { %v2371_v27 = vadd.f32 %v2957_v24, %v2364_v25 }
0x11fc   : > { %v2372_v23 = vpack.c.bf16 %v2371_v27, %v2371_v27 }
0x11fe   : > { %3223 = vmatmul.mubr.msk.bf16.vlgmr.msra.gmra.mrb[48].mxu0 %vm896_vm1, %v2372_v23 }
0x12d1   : > { %v2433_v33 = vpop.f32.mrb[48].mxu0 }
0x12d2   : > { %v2434_v34 = vadd.f32 %v2958_v32, %v2433_v33  ;;  %v3224_v35 = vpop.f32.mrb[49].mxu0 }
0x12d3   : > { %v2436_v36 = vpop.f32.mrb[50].mxu0 }
0x12d4   : > { %v2962_v37 = vmul.f32 -1.702, %v2434_v34  ;;  %v3225_v38 = vpop.f32.mrb[51].mxu0 }
0x12d6   : > { %v2441_v39 = vmul.f32 1.442695, %v2962_v37 }
0x12d8   : > { %3362 = vpow2.f32 %v2441_v39 }
0x12e2   : > { %v3363_v40 = vpop.eup %3362 }
0x12e3   : > { %v2443_v41 = vadd.f32 1.0, %v3363_v40 }
0x12e5   : > { %3364 = vrcp.f32 %v2443_v41 }
0x12ef   : > { %v3365_v10 = vpop.eup %3364 }
0x12f0   : > { %v2446_v42 = vmul.f32 %v3365_v10, %v2434_v34 }
0x12f2   : > { %v2447_v26 = vpack.c.bf16 %v2446_v42, %v2446_v42 }
0x12f4   : > { %3235 = vmatmul.mubr.msk.bf16.vlgmr.msra.gmra.mrb[48].mxu1 %vm2487_vm6, %v2447_v26 }
0x13c6   : > { %2536 = sbr.rel (%p2969_p1) target bundleno = 5382 (0x1506), region = 104 }
0x13c7   : > { %v2525_v44 = vpop.f32.mrb[48].mxu1 }
0x13c8   : > { %v2526_v45 = vadd.f32 %v2963_v43, %v2525_v44  ;;  %v3236_v46 = vpop.f32.mrb[49].mxu1 }
0x13c9   : > { %v2528_v47 = vpop.f32.mrb[50].mxu1 }
0x13ca   : > { %v2531_v48 = vadd.f32 %v2526_v45, %v2342_v8  ;;  %v3237_v49 = vpop.f32.mrb[51].mxu1 }
0x13cc   : > { %2532 = vst.msk [vmem:[#allocation2] sm:$0xff] %vm896_vm1, %v2531_v48  ;;  %v2539_v50 = vsel (!%p2969_p1), %vm896_vm1, %v2531_v48, 0.0 }
0x13cd   : > { %2540 = vadd.xlane.f32.xlu0 %v2539_v50 }
0x145a   : > { %v2541_v51 = vpop.xlane.xlu0 %2540 }
0x145b   : > { %v2542_v52 = vmul.f32 0.03125, %v2541_v51 }
0x145d   : > { %v2543_v53 = vsub.f32 %v2531_v48, %v2542_v52 }
0x145f   : > { %v2544_v54 = vmul.f32 %v2543_v53, %v2543_v53 }
0x1461   : > { %v2545_v57 = vsel %vm896_vm1, %v2544_v54, 0.0 }
0x1462   : > { %2546 = vadd.xlane.f32.xlu0 %v2545_v57 }
0x14ef   : > { %v2547_v55 = vpop.xlane.xlu0 %2546 }
0x14f0   : > { %v2548_v56 = vmul.f32 0.03125, %v2547_v55 }
0x14f2   : > { %v2549_v58 = vadd.f32 1e-05, %v2548_v56 }
0x14f4   : > { %3366 = vrsqrt.f32 %v2549_v58 }
0x14fe   : > { %v3367_v59 = vpop.eup %3366 }
0x14ff   : > { %v2551_v61 = vmul.f32 %v3367_v59, %v2543_v53 }
0x1501   : > { %v2558_v63 = vmul.f32 %v2970_v60, %v2551_v61 }
0x1503   : > { %v2565_v0 = vadd.f32 %v2971_v62, %v2558_v63 }
0x1505   : > { %2566 = vst.msk [vmem:[%s811_s17] sm:$0xff] %vm896_vm1, %v2565_v0 }
0x1506 PF: > { %s4147_s24 = sld [smem:[#allocation10_spill]]  ;;  %s4148_s20 = sld [smem:[#allocation7_spill]] }
0x1507   : > { %s4150_s2 = sld [smem:[#allocation36_spill]]  ;;  %s2581_s27 = sshll.u32 %s811_s17, 4  ;;  %s2582_s27 = int_to_ptr.vmem [resolvable:$true] %s2581_s27 }
0x1508   : > { %s3368_s18 = scalar_lea.vmem %s2582_s27, 128  ;;  %s3467_s9 = smov [#allocation3]  }
0x1509   : > { %p3369_p2 = scmp.ne.s32.totalorder %s2582_s27, %s3368_s18  ;;  %s3372_s5 = sshll.u32 %s3467_s9, 4  ;;  %s3373_s5 = int_to_ptr.vmem [resolvable:$false] %s3372_s5 }
0x150a   : > { %s3374_s13 = scalar_lea.vmem %s3373_s5, 256  ;;  %p3375_p6 = scmp.lt.s32.totalorder %s2582_s27, %s3373_s5 }
0x150b   : > { %p3370_p4 = pnand %p3369_p2, %p3617_p3  ;;  %p3376_p7 = scmp.lt.s32.totalorder %s3374_s13, %s3368_s18 }
0x150c   : > { %s2973_s19 = sshll.u32 %s4147_s24, 7  ;;  %s4152_s8 = sand.u32 1, %s4148_s20  }
0x150d   : > { %s4151_s25 = smov %s4150_s2  ;;  %s3999_s7 = scalar_lea.hbm %s4150_s2, %s2973_s19 }
0x150e   : > { %s2568_s1 = scalar_lea.sflag [#allocation4], %s4152_s8  ;;  %p3371_p5 = pneg %p3370_p4 }
0x150f   : > { %p3377_p8 = por %p3376_p7, %p3375_p6 }
0x1511   : > { %p3378_p10 = pnand %p3377_p8, %p3371_p5 }
0x1513   : > { %3381 = shalt.err (!%p3378_p10)
}
0x1514   : > { %s3382_s22 = scalar_lea.hbm %s3999_s7, 128  ;;  %s3386_s10 = scalar_lea.hbm %s4151_s25, 256 }
0x1515   : > { %p3383_p11 = scmp.ne.s32.totalorder %s3999_s7, %s3382_s22  ;;  %p3387_p0 = scmp.lt.u32.totalorder %s3999_s7, %s4151_s25 }
0x1516   : > { %p3388_p1 = scmp.lt.u32.totalorder %s3386_s10, %s3382_s22  ;;  %p3390_p4 = scmp.lt.u32.totalorder %s3382_s22, %s3999_s7 }
0x1517   : > { %p3384_p12 = pnand %p3383_p11, %p3617_p3 }
0x1518   : > { %p3389_p2 = por %p3388_p1, %p3387_p0 }
0x1519   : > { %p3385_p13 = pneg %p3384_p12 }
0x151a   : > { %p3391_p5 = por %p3390_p4, %p3389_p2 }
0x151c   : > { %p3392_p6 = pnand %p3391_p5, %p3385_p13 }
0x151e   : > { %3395 = shalt.err (!%p3392_p6)
}
0x151f   : > { %3238 = dma.vmem_to_hbm [thread:$0]  (%p3617_p3), %s2582_s27, 128, %s3999_s7, %s2568_s1  }
0x1520 PF: > { %s4153_s0 = sld [smem:[#allocation13_spill]]  ;;  %s4154_s3 = sld [smem:[#allocation6_spill]] }
0x1526   : > { %p3244_p7 = scmp.ge.s32.totalorder %s4153_s0, 2  ;;  %s2593_s21 = sand.u32 1, %s4154_s3  }
0x1527   : > { %s2594_s26 = scalar_lea.sflag [#allocation4], %s2593_s21 }
0x1528   : > { %p3241_p8 = pnand %p3244_p7, %p3627_p9 }
0x152a   : > { %3429 = dma.done.wait (!%p3241_p8), %s2594_s26, 128  }
0x152b   : > { %3431 = vsyncadd (!%p3241_p8), %s2594_s26, 4294967168  ;;  %s32_s23 = sadd.s32 1, %s4153_s0   ;;  %s4156_s0 = sld [smem:[#allocation7_spill]] }
0x152c   : > { %p29_p10 = scmp.ge.s32.totalorder %s32_s23, 6   ;;  %s4157_s30 = sld [smem:[#allocation8_spill]] }
0x152d   : > { %s4158_s20 = sld [smem:[#allocation18_spill]]  ;;  %s4159_s21 = sld [smem:[#allocation11_spill]] }
0x152e   : > { %s4160_s1 = sld [smem:[#allocation12_spill]]  ;;  %s4161_s22 = sld [smem:[#allocation14_spill]] }
0x152f   : > { %s4162_s2 = sld [smem:[#allocation16_spill]]  ;;  %31 = sbr.rel (!%p29_p10) target bundleno = 22 (0x16), region = 208 }
0x1536   :  { %2599 = vsyncpa [#allocation4], 1 }
0x1537   :  { %2601 = vsyncpa [#allocation4 + $0x1], 1 }

</bundles_post_ra>
